<compile_context>
chip_gen: v6e
topology: v6e:2x2x1
jax: 0.10.0
libtpu: 0.0.40
codegen_flags: <defaults>
</compile_context>

<pallas_src>
import functools

import jax
import jax.numpy as jnp
from jax.experimental import pallas as pl
from jax.experimental.pallas import tpu as pltpu

NUM_CLASSES = 10
PADDED_CLASSES = 128      # lane-dense fc3 / output width
IN_FEATURES = 32 * 32 * 3  # 3072
H1, H2 = 256, 128


def _round_up(x, m):
    return (x + m - 1) // m * m


def _pick_tiling():
    """Generation-specific (tile_b, vmem_limit_bytes).

    The f32 x tile is the big VMEM consumer (tile_b * 3072 * 4 bytes,
    double-buffered). v5e/v6e have 128 MiB VMEM per TensorCore, v7x only
    64 MiB, so shrink the batch tile there. Falls back to the conservative
    (v7x-safe) budget if the hardware query is unavailable.
    """
    try:
        vmem_cap = pltpu.get_tpu_info().vmem_capacity_bytes
    except Exception:
        vmem_cap = 64 * 1024 * 1024
    if vmem_cap >= 96 * 1024 * 1024:        # v5e / v6e (128 MiB VMEM)
        return 1024, 64 * 1024 * 1024
    return 512, 40 * 1024 * 1024            # v7x (64 MiB VMEM per TC)


def mlp_kernel(x_ref, w1_ref, b1_ref, w2_ref, b2_ref, w3_ref, b3_ref, o_ref):
    # x_ref: (TILE_B, 3072) f32 streamed straight from HBM; cast to bf16 here
    # (VPU cast is hidden under the MXU) instead of a separate XLA pre-pass.
    x = x_ref[...].astype(jnp.bfloat16)

    # fc1 + ReLU (bf16 MXU, f32 accumulation)
    h1 = jnp.dot(x, w1_ref[...], preferred_element_type=jnp.float32) + b1_ref[...]
    h1 = jnp.maximum(h1, 0.0)

    # fc2 + ReLU
    h2 = jnp.dot(h1.astype(jnp.bfloat16), w2_ref[...],
                 preferred_element_type=jnp.float32) + b2_ref[...]
    h2 = jnp.maximum(h2, 0.0)

    # fc3 (zero-padded to 128 lane-dense output columns)
    logits = jnp.dot(h2.astype(jnp.bfloat16), w3_ref[...],
                     preferred_element_type=jnp.float32) + b3_ref[...]

    # mask padded classes, then numerically-stable log_softmax over the lane dim
    lane = jax.lax.broadcasted_iota(jnp.int32, logits.shape, 1)
    logits = jnp.where(lane < NUM_CLASSES, logits, -jnp.inf)
    m = jnp.max(logits, axis=-1, keepdims=True)
    z = logits - m
    lse = jnp.log(jnp.sum(jnp.exp(z), axis=-1, keepdims=True))
    o_ref[...] = (z - lse).astype(o_ref.dtype)


@functools.partial(jax.jit, static_argnames=("tile_b",))
def mlp_forward(x_nchw, w1, b1, w2, b2, w3, b3, *, tile_b=None):
    n = x_nchw.shape[0]
    # matches torch `x.view(-1, 32*32*3)` on contiguous NCHW input; pure
    # metadata reshape -- NO dtype cast here (x streamed f32, cast in-kernel).
    # (Callers that already hold bf16 activations can pass them directly and
    # halve x HBM traffic again.)
    x = x_nchw.reshape(n, IN_FEATURES)

    default_tile_b, vmem_limit = _pick_tiling()
    if tile_b is None:
        tile_b = default_tile_b

    # bf16 streaming weights (MXU-native), f32 biases
    w1b = w1.astype(jnp.bfloat16)
    w2b = w2.astype(jnp.bfloat16)
    b1f = b1.astype(jnp.float32)
    b2f = b2.astype(jnp.float32)
    # zero-pad fc3 to 128 output lanes (lane-dense matmul + unmasked stores)
    w3p = jnp.zeros((H2, PADDED_CLASSES), jnp.float32)
    w3p = w3p.at[:, :NUM_CLASSES].set(w3.astype(jnp.float32)).astype(jnp.bfloat16)
    b3p = jnp.zeros((1, PADDED_CLASSES), jnp.float32)
    b3p = b3p.at[:, :NUM_CLASSES].set(b3.astype(jnp.float32))

    # batch tiling: 16-row multiples (bf16 packs 16 sublanes per vreg); keep
    # >=2 grid steps when the batch allows it so the 'parallel' batch axis can
    # shard across both TensorCores on v7x.
    tile_b = max(16, min(tile_b, _round_up(n, 16)))
    if n >= 32:
        tile_b = min(tile_b, _round_up((n + 1) // 2, 16))
    n_pad = _round_up(n, tile_b)
    if n_pad != n:
        x = jnp.pad(x, ((0, n_pad - n), (0, 0)))
    grid = (n_pad // tile_b,)

    bytes_accessed = (
        n_pad * IN_FEATURES * 4                                    # x (f32)
        + (IN_FEATURES * H1 + H1 * H2 + H2 * PADDED_CLASSES) * 2   # weights bf16
        + (H1 + H2 + PADDED_CLASSES) * 4                           # biases f32
        + n_pad * PADDED_CLASSES * 2                               # output bf16
    )
    cost = pl.CostEstimate(
        flops=2 * n_pad * (IN_FEATURES * H1 + H1 * H2 + H2 * PADDED_CLASSES),
        transcendentals=n_pad * PADDED_CLASSES,
        bytes_accessed=bytes_accessed,
    )

    const = lambda i: (0, 0)  # weights / biases: same block every grid step
    out_full = pl.pallas_call(
        mlp_kernel,
        out_shape=jax.ShapeDtypeStruct((n_pad, PADDED_CLASSES), jnp.bfloat16),
        grid=grid,
        in_specs=[
            pl.BlockSpec((tile_b, IN_FEATURES), lambda i: (i, 0)),   # x tile (f32)
            pl.BlockSpec((IN_FEATURES, H1), const),                  # w1
            pl.BlockSpec((1, H1), const),                            # b1
            pl.BlockSpec((H1, H2), const),                           # w2
            pl.BlockSpec((1, H2), const),                            # b2
            pl.BlockSpec((H2, PADDED_CLASSES), const),               # w3 (padded)
            pl.BlockSpec((1, PADDED_CLASSES), const),                # b3 (padded)
        ],
        out_specs=pl.BlockSpec((tile_b, PADDED_CLASSES), lambda i: (i, 0)),
        compiler_params=pltpu.CompilerParams(
            dimension_semantics=("parallel",),
            vmem_limit_bytes=vmem_limit,
        ),
        cost_estimate=cost,
    )(x, w1b, b1f, w2b, b2f, w3p, b3p)

    # slice off padded rows / classes; return f32 like the torch module
    return out_full[:n, :NUM_CLASSES].astype(jnp.float32)


def init_params(key):
    """Deterministic init mimicking PyTorch Linear default: U(-1/sqrt(fan_in), ...)."""
    def linear(key, fan_in, fan_out):
        kw, kb = jax.random.split(key)
        bound = 1.0 / jnp.sqrt(fan_in)
        # stored as (in, out) so kernel does x @ W
        w = jax.random.uniform(kw, (fan_in, fan_out), jnp.float32, -bound, bound)
        b = jax.random.uniform(kb, (1, fan_out), jnp.float32, -bound, bound)
        return w, b

    k1, k2, k3 = jax.random.split(key, 3)
    w1, b1 = linear(k1, IN_FEATURES, H1)
    w2, b2 = linear(k2, H1, H2)
    w3, b3 = linear(k3, H2, NUM_CLASSES)
    return w1, b1, w2, b2, w3, b3


def _reference(x_nchw, w1, b1, w2, b2, w3, b3):
    x = x_nchw.reshape(x_nchw.shape[0], -1).astype(jnp.float32)
    h1 = jnp.maximum(x @ w1 + b1, 0.0)
    h2 = jnp.maximum(h1 @ w2 + b2, 0.0)
    logits = h2 @ w3 + b3
    return jax.nn.log_softmax(logits, axis=-1)


if __name__ == "__main__":
    key = jax.random.PRNGKey(0)
    k_params, k_x = jax.random.split(key)

    # CIFAR-10 shaped input, small batch
    x = jax.random.normal(k_x, (2, 3, 32, 32), jnp.float32)
    params = init_params(k_params)

    out = mlp_forward(x, *params)
    jax.block_until_ready(out)

    assert out.shape == (2, NUM_CLASSES)
    # log_softmax rows should sum (in prob space) to ~1 (bf16 writeback -> loose tol)
    probs_sum = jnp.sum(jnp.exp(out), axis=-1)
    assert jnp.allclose(probs_sum, 1.0, atol=2e-2)
    # loose tolerance vs f32 reference (bf16 inputs/weights/output, f32 accumulation)
    ref = _reference(x, *params)
    assert jnp.allclose(out, ref, atol=0.1)

    print("KERNEL_OK")
</pallas_src>

<mosaic_0001>
module attributes {stable_mosaic.version = 11 : i64} {
  func.func @mlp_kernel(%arg0: i32, %arg1: memref<16x3072xf32, #tpu.memory_space<vmem>>, %arg2: memref<3072x256xbf16, #tpu.memory_space<vmem>>, %arg3: memref<1x256xf32, #tpu.memory_space<vmem>>, %arg4: memref<256x128xbf16, #tpu.memory_space<vmem>>, %arg5: memref<1x128xf32, #tpu.memory_space<vmem>>, %arg6: memref<128x128xbf16, #tpu.memory_space<vmem>>, %arg7: memref<1x128xf32, #tpu.memory_space<vmem>>, %arg8: memref<16x128xbf16, #tpu.memory_space<vmem>>) attributes {dimension_semantics = [#tpu.dimension_semantics<parallel>], iteration_bounds = array<i64: 1>, scalar_prefetch = 0 : i64, scratch_operands = 0 : i64, tpu.core_type = #tpu.core_type<tc>, window_params = [{transform_indices = @transform_0, window_bounds = array<i64: 16, 3072>}, {pipeline_mode = #tpu.pipeline_mode<synchronous>, transform_indices = @transform_1, window_bounds = array<i64: 3072, 256>}, {pipeline_mode = #tpu.pipeline_mode<synchronous>, transform_indices = @transform_2, window_bounds = array<i64: 1, 256>}, {pipeline_mode = #tpu.pipeline_mode<synchronous>, transform_indices = @transform_3, window_bounds = array<i64: 256, 128>}, {pipeline_mode = #tpu.pipeline_mode<synchronous>, transform_indices = @transform_4, window_bounds = array<i64: 1, 128>}, {pipeline_mode = #tpu.pipeline_mode<synchronous>, transform_indices = @transform_5, window_bounds = array<i64: 128, 128>}, {pipeline_mode = #tpu.pipeline_mode<synchronous>, transform_indices = @transform_6, window_bounds = array<i64: 1, 128>}, {transform_indices = @transform_7, window_bounds = array<i64: 16, 128>}]} {
    %c0 = arith.constant 0 : index
    %c0_0 = arith.constant 0 : index
    %0 = vector.load %arg1[%c0, %c0_0] : memref<16x3072xf32, #tpu.memory_space<vmem>>, vector<16x3072xf32>
    %1 = arith.truncf %0 : vector<16x3072xf32> to vector<16x3072xbf16>
    %c0_1 = arith.constant 0 : index
    %c0_2 = arith.constant 0 : index
    %2 = vector.load %arg2[%c0_1, %c0_2] : memref<3072x256xbf16, #tpu.memory_space<vmem>>, vector<3072x256xbf16>
    %cst = arith.constant dense<0.000000e+00> : vector<16x256xf32>
    %3 = tpu.matmul %1, %2, %cst {dimension_numbers = #tpu.dot_dimension_numbers<[1], [0], [0], [1], [0, 0, 1, 1], [], []>} : vector<16x3072xbf16>, vector<3072x256xbf16>, vector<16x256xf32> -> vector<16x256xf32>
    %c0_3 = arith.constant 0 : index
    %c0_4 = arith.constant 0 : index
    %4 = vector.load %arg3[%c0_3, %c0_4] : memref<1x256xf32, #tpu.memory_space<vmem>>, vector<1x256xf32>
    %5 = vector.broadcast %4 : vector<1x256xf32> to vector<16x256xf32>
    %6 = arith.addf %3, %5 : vector<16x256xf32>
    %cst_5 = arith.constant 0.000000e+00 : f32
    %7 = vector.broadcast %cst_5 : f32 to vector<16x256xf32>
    %8 = arith.maximumf %6, %7 : vector<16x256xf32>
    %9 = arith.truncf %8 : vector<16x256xf32> to vector<16x256xbf16>
    %c0_6 = arith.constant 0 : index
    %c0_7 = arith.constant 0 : index
    %10 = vector.load %arg4[%c0_6, %c0_7] : memref<256x128xbf16, #tpu.memory_space<vmem>>, vector<256x128xbf16>
    %cst_8 = arith.constant dense<0.000000e+00> : vector<16x128xf32>
    %11 = tpu.matmul %9, %10, %cst_8 {dimension_numbers = #tpu.dot_dimension_numbers<[1], [0], [0], [1], [0, 0, 1, 1], [], []>} : vector<16x256xbf16>, vector<256x128xbf16>, vector<16x128xf32> -> vector<16x128xf32>
    %c0_9 = arith.constant 0 : index
    %c0_10 = arith.constant 0 : index
    %12 = vector.load %arg5[%c0_9, %c0_10] : memref<1x128xf32, #tpu.memory_space<vmem>>, vector<1x128xf32>
    %13 = vector.broadcast %12 : vector<1x128xf32> to vector<16x128xf32>
    %14 = arith.addf %11, %13 : vector<16x128xf32>
    %cst_11 = arith.constant 0.000000e+00 : f32
    %15 = vector.broadcast %cst_11 : f32 to vector<16x128xf32>
    %16 = arith.maximumf %14, %15 : vector<16x128xf32>
    %17 = arith.truncf %16 : vector<16x128xf32> to vector<16x128xbf16>
    %c0_12 = arith.constant 0 : index
    %c0_13 = arith.constant 0 : index
    %18 = vector.load %arg6[%c0_12, %c0_13] : memref<128x128xbf16, #tpu.memory_space<vmem>>, vector<128x128xbf16>
    %cst_14 = arith.constant dense<0.000000e+00> : vector<16x128xf32>
    %19 = tpu.matmul %17, %18, %cst_14 {dimension_numbers = #tpu.dot_dimension_numbers<[1], [0], [0], [1], [0, 0, 1, 1], [], []>} : vector<16x128xbf16>, vector<128x128xbf16>, vector<16x128xf32> -> vector<16x128xf32>
    %c0_15 = arith.constant 0 : index
    %c0_16 = arith.constant 0 : index
    %20 = vector.load %arg7[%c0_15, %c0_16] : memref<1x128xf32, #tpu.memory_space<vmem>>, vector<1x128xf32>
    %21 = vector.broadcast %20 : vector<1x128xf32> to vector<16x128xf32>
    %22 = arith.addf %19, %21 : vector<16x128xf32>
    %23 = tpu.iota {dimensions = array<i32: 1>} : vector<16x128xi32>
    %c10_i32 = arith.constant 10 : i32
    %24 = vector.broadcast %c10_i32 : i32 to vector<16x128xi32>
    %25 = arith.cmpi slt, %23, %24 : vector<16x128xi32>
    %cst_17 = arith.constant 0xFF800000 : f32
    %26 = vector.broadcast %cst_17 : f32 to vector<16x128xf32>
    %27 = arith.select %25, %22, %26 : vector<16x128xi1>, vector<16x128xf32>
    %cst_18 = arith.constant dense<0xFF800000> : vector<16xf32>
    %28 = vector.multi_reduction <maximumf>, %27, %cst_18 [1] : vector<16x128xf32> to vector<16xf32>
    %29 = vector.shape_cast %28 : vector<16xf32> to vector<16x1xf32>
    %30 = vector.broadcast %29 : vector<16x1xf32> to vector<16x128xf32>
    %31 = arith.subf %27, %30 : vector<16x128xf32>
    %32 = math.exp %31 : vector<16x128xf32>
    %cst_19 = arith.constant dense<0.000000e+00> : vector<16xf32>
    %33 = vector.multi_reduction <add>, %32, %cst_19 [1] : vector<16x128xf32> to vector<16xf32>
    %34 = vector.shape_cast %33 : vector<16xf32> to vector<16x1xf32>
    %35 = math.log %34 : vector<16x1xf32>
    %36 = vector.broadcast %35 : vector<16x1xf32> to vector<16x128xf32>
    %37 = arith.subf %31, %36 : vector<16x128xf32>
    %38 = arith.truncf %37 : vector<16x128xf32> to vector<16x128xbf16>
    %c0_20 = arith.constant 0 : index
    %c0_21 = arith.constant 0 : index
    %39 = vector.load %arg8[%c0_20, %c0_21] : memref<16x128xbf16, #tpu.memory_space<vmem>>, vector<16x128xbf16>
    tpu.vector_store %arg8[%c0_20, %c0_21], %38 {strides = array<i32>} : memref<16x128xbf16, #tpu.memory_space<vmem>>, vector<16x128xbf16>,
    return
  }
  func.func @transform_0(%arg0: i32) -> (i32, i32) {
    %c0_i32 = arith.constant 0 : i32
    %c0_i32_0 = arith.constant 0 : i32
    return %arg0, %c0_i32 : i32, i32
  }
  func.func @transform_1(%arg0: i32) -> (i32, i32) {
    %c0_i32 = arith.constant 0 : i32
    %c0_i32_0 = arith.constant 0 : i32
    %c0_i32_1 = arith.constant 0 : i32
    return %c0_i32, %c0_i32_0 : i32, i32
  }
  func.func @transform_2(%arg0: i32) -> (i32, i32) {
    %c0_i32 = arith.constant 0 : i32
    %c0_i32_0 = arith.constant 0 : i32
    %c0_i32_1 = arith.constant 0 : i32
    return %c0_i32, %c0_i32_0 : i32, i32
  }
  func.func @transform_3(%arg0: i32) -> (i32, i32) {
    %c0_i32 = arith.constant 0 : i32
    %c0_i32_0 = arith.constant 0 : i32
    %c0_i32_1 = arith.constant 0 : i32
    return %c0_i32, %c0_i32_0 : i32, i32
  }
  func.func @transform_4(%arg0: i32) -> (i32, i32) {
    %c0_i32 = arith.constant 0 : i32
    %c0_i32_0 = arith.constant 0 : i32
    %c0_i32_1 = arith.constant 0 : i32
    return %c0_i32, %c0_i32_0 : i32, i32
  }
  func.func @transform_5(%arg0: i32) -> (i32, i32) {
    %c0_i32 = arith.constant 0 : i32
    %c0_i32_0 = arith.constant 0 : i32
    %c0_i32_1 = arith.constant 0 : i32
    return %c0_i32, %c0_i32_0 : i32, i32
  }
  func.func @transform_6(%arg0: i32) -> (i32, i32) {
    %c0_i32 = arith.constant 0 : i32
    %c0_i32_0 = arith.constant 0 : i32
    %c0_i32_1 = arith.constant 0 : i32
    return %c0_i32, %c0_i32_0 : i32, i32
  }
  func.func @transform_7(%arg0: i32) -> (i32, i32) {
    %c0_i32 = arith.constant 0 : i32
    %c0_i32_0 = arith.constant 0 : i32
    return %arg0, %c0_i32 : i32, i32
  }
}

</mosaic_0001>

<bundles_post_ra>
// kernel: mlp_forward.1
= control target key start
LH: loop header
LB: loop body
LE: loop exit
PB: predicated region body
PF: predicated region fallthrough
CT: control target
= control target key end

     0   :  { %vm4348_vm0 = vmmov 0   ;;  %s5780_s1 = inlined_call_operand.vmem [shape: bf16[3072,256], index: 1, kind: input, shape index: {}]   ;;  %s5781_s0 = inlined_call_operand.vmem [shape: f32[16,3072], index: 0, kind: input, shape index: {}]   ;;  %s5782_s3 = inlined_call_operand.vmem [shape: bf16[256,128], index: 3, kind: input, shape index: {}]   ;;  %s5783_s5 = inlined_call_operand.vmem [shape: bf16[128,128], index: 5, kind: input, shape index: {}]   ;;  %s5784_s2 = inlined_call_operand.vmem [shape: f32[1,256], index: 2, kind: input, shape index: {}]   ;;  %s5785_s4 = inlined_call_operand.vmem [shape: f32[1,128], index: 4, kind: input, shape index: {}]   ;;  %s5786_s6 = inlined_call_operand.vmem [shape: f32[1,128], index: 6, kind: input, shape index: {}]   ;;  %s5787_s7 = inlined_call_operand.vmem [shape: bf16[16,128], index: 7, kind: output, shape index: {}]  }
   0x1   :  { %v3739_v0 = vld [vmem:[%s5780_s1 + $0x74] ss:$8 sps:$4 sm:$0xff]   ;;  %v3743_v2 = vld [vmem:[%s5780_s1 + $0x70] ss:$8 sps:$4 sm:$0xff]   ;;  %v3745_v4 = vld [vmem:[%s5780_s1 + $0x64] ss:$8 sps:$4 sm:$0xff]  }
   0x2   :  { %v3741_v1 = vld [vmem:[%s5780_s1 + $0x174] ss:$8 sps:$4 sm:$0xff]   ;;  %2415 = vmatprep.subr.bf16.mxu0 %v3739_v0  ;;  %v3744_v3 = vld [vmem:[%s5780_s1 + $0x170] ss:$8 sps:$4 sm:$0xff]   ;;  %v3747_v5 = vld [vmem:[%s5780_s1 + $0x164] ss:$8 sps:$4 sm:$0xff]  }
   0x3   :  { %2458 = vmatprep.subr.bf16.mxu1 %v3741_v1  ;;  %2416 = vmatpush1.bf16.msra.mxu0 %v3743_v2  ;;  %v3749_v6 = vld [vmem:[%s5780_s1 + $0x60] ss:$8 sps:$4 sm:$0xff]   ;;  %v3751_v8 = vld [vmem:[%s5780_s1 + $0x54] ss:$8 sps:$4 sm:$0xff]   ;;  %v3755_v10 = vld [vmem:[%s5780_s1 + $0x50] ss:$8 sps:$4 sm:$0xff]  }
   0x4   :  { %2459 = vmatpush1.bf16.msra.mxu1 %v3744_v3  ;;  %2417 = vmatprep.subr.bf16.mxu0 %v3745_v4  ;;  %v3750_v7 = vld [vmem:[%s5780_s1 + $0x160] ss:$8 sps:$4 sm:$0xff]   ;;  %v3753_v9 = vld [vmem:[%s5780_s1 + $0x154] ss:$8 sps:$4 sm:$0xff]   ;;  %v3756_v11 = vld [vmem:[%s5780_s1 + $0x150] ss:$8 sps:$4 sm:$0xff]  }
   0x5   :  { %2460 = vmatprep.subr.bf16.mxu1 %v3747_v5  ;;  %v3757_v12 = vld [vmem:[%s5780_s1 + $0x44] ss:$8 sps:$4 sm:$0xff]   ;;  %v3761_v14 = vld [vmem:[%s5780_s1 + $0x40] ss:$8 sps:$4 sm:$0xff]   ;;  %v3763_v16 = vld [vmem:[%s5780_s1 + $0x34] ss:$8 sps:$4 sm:$0xff]  }
   0x6   :  { %v3759_v13 = vld [vmem:[%s5780_s1 + $0x144] ss:$8 sps:$4 sm:$0xff]   ;;  %v3762_v15 = vld [vmem:[%s5780_s1 + $0x140] ss:$8 sps:$4 sm:$0xff]   ;;  %v3765_v17 = vld [vmem:[%s5780_s1 + $0x134] ss:$8 sps:$4 sm:$0xff]  }
   0x7   :  { %2418 = vmatpush1.bf16.msra.mxu0 %v3749_v6  ;;  %v3767_v18 = vld [vmem:[%s5780_s1 + $0x30] ss:$8 sps:$4 sm:$0xff]   ;;  %v3769_v20 = vld [vmem:[%s5780_s1 + $0x24] ss:$8 sps:$4 sm:$0xff]   ;;  %v3773_v22 = vld [vmem:[%s5780_s1 + $0x20] ss:$8 sps:$4 sm:$0xff]  }
   0x8   :  { %2461 = vmatpush1.bf16.msra.mxu1 %v3750_v7  ;;  %2419 = vmatprep.subr.bf16.mxu0 %v3751_v8  ;;  %v3768_v19 = vld [vmem:[%s5780_s1 + $0x130] ss:$8 sps:$4 sm:$0xff]   ;;  %v3771_v21 = vld [vmem:[%s5780_s1 + $0x124] ss:$8 sps:$4 sm:$0xff]   ;;  %v3774_v23 = vld [vmem:[%s5780_s1 + $0x120] ss:$8 sps:$4 sm:$0xff]  }
   0x9   :  { %2462 = vmatprep.subr.bf16.mxu1 %v3753_v9  ;;  %v3775_v24 = vld [vmem:[%s5780_s1 + $0x14] ss:$8 sps:$4 sm:$0xff]   ;;  %v3779_v26 = vld [vmem:[%s5780_s1 + $0x10] ss:$8 sps:$4 sm:$0xff]   ;;  %v3781_v28 = vld [vmem:[%s5780_s1 + $0x4] ss:$8 sps:$4 sm:$0xff]  }
   0xa   :  { %v3777_v25 = vld [vmem:[%s5780_s1 + $0x114] ss:$8 sps:$4 sm:$0xff]   ;;  %v3780_v27 = vld [vmem:[%s5780_s1 + $0x110] ss:$8 sps:$4 sm:$0xff]   ;;  %v3783_v29 = vld [vmem:[%s5780_s1 + $0x104] ss:$8 sps:$4 sm:$0xff]  }
   0xb   :  { %2420 = vmatpush1.bf16.msra.mxu0 %v3755_v10  ;;  %v3785_v30 = vld [vmem:[%s5780_s1] ss:$8 sps:$4 sm:$0xff]   ;;  %v3787_v32 = vld [vmem:[%s5780_s1 + $0xf4] ss:$8 sps:$4 sm:$0xff]   ;;  %v3791_v34 = vld [vmem:[%s5780_s1 + $0xf0] ss:$8 sps:$4 sm:$0xff]  }
   0xc   :  { %2463 = vmatpush1.bf16.msra.mxu1 %v3756_v11  ;;  %2421 = vmatprep.subr.bf16.mxu0 %v3757_v12  ;;  %v3786_v31 = vld [vmem:[%s5780_s1 + $0x100] ss:$8 sps:$4 sm:$0xff]   ;;  %v3789_v33 = vld [vmem:[%s5780_s1 + $0x1f4] ss:$8 sps:$4 sm:$0xff]   ;;  %v3792_v35 = vld [vmem:[%s5780_s1 + $0x1f0] ss:$8 sps:$4 sm:$0xff]  }
   0xd   :  { %2464 = vmatprep.subr.bf16.mxu1 %v3759_v13  ;;  %v3793_v36 = vld [vmem:[%s5780_s1 + $0xe4] ss:$8 sps:$4 sm:$0xff]   ;;  %v3797_v38 = vld [vmem:[%s5780_s1 + $0xe0] ss:$8 sps:$4 sm:$0xff]   ;;  %v3799_v40 = vld [vmem:[%s5780_s1 + $0xd4] ss:$8 sps:$4 sm:$0xff]  }
   0xe   :  { %v3795_v37 = vld [vmem:[%s5780_s1 + $0x1e4] ss:$8 sps:$4 sm:$0xff]   ;;  %v3798_v39 = vld [vmem:[%s5780_s1 + $0x1e0] ss:$8 sps:$4 sm:$0xff]   ;;  %v3801_v41 = vld [vmem:[%s5780_s1 + $0x1d4] ss:$8 sps:$4 sm:$0xff]  }
   0xf   :  { %2422 = vmatpush1.bf16.msra.mxu0 %v3761_v14  ;;  %v3803_v42 = vld [vmem:[%s5780_s1 + $0xd0] ss:$8 sps:$4 sm:$0xff]   ;;  %v3805_v44 = vld [vmem:[%s5780_s1 + $0xc4] ss:$8 sps:$4 sm:$0xff]   ;;  %v3809_v50 = vld [vmem:[%s5780_s1 + $0xc0] ss:$8 sps:$4 sm:$0xff]  }
  0x10   :  { %2465 = vmatpush1.bf16.msra.mxu1 %v3762_v15  ;;  %2423 = vmatprep.subr.bf16.mxu0 %v3763_v16  ;;  %v3804_v43 = vld [vmem:[%s5780_s1 + $0x1d0] ss:$8 sps:$4 sm:$0xff]   ;;  %v3807_v45 = vld [vmem:[%s5780_s1 + $0x1c4] ss:$8 sps:$4 sm:$0xff]   ;;  %v3810_v51 = vld [vmem:[%s5780_s1 + $0x1c0] ss:$8 sps:$4 sm:$0xff]  }
  0x11   :  { %2466 = vmatprep.subr.bf16.mxu1 %v3765_v17  ;;  %v28_v46 = vld [vmem:[%s5781_s0 + $0x8] sm:$0xff]  ;;  %v30_v48 = vld [vmem:[%s5781_s0 + $0x18] sm:$0xff]  ;;  %v27_v6 = vld [vmem:[%s5781_s0] sm:$0xff] }
  0x12   :  { %v52_v47 = vld [vmem:[%s5781_s0 + $0xc8] sm:$0xff]  ;;  %v54_v49 = vld [vmem:[%s5781_s0 + $0xd8] sm:$0xff]  ;;  %v51_v7 = vld [vmem:[%s5781_s0 + $0xc0] sm:$0xff] }
  0x13   :  { %2424 = vmatpush1.bf16.msra.mxu0 %v3767_v18  ;;  %v3811_v52 = vld [vmem:[%s5780_s1 + $0xb4] ss:$8 sps:$4 sm:$0xff]   ;;  %v76_v53 = vpack.c.bf16 %v52_v47, %v28_v46  ;;  %v78_v54 = vpack.c.bf16 %v54_v49, %v30_v48  ;;  %v3815_v56 = vld [vmem:[%s5780_s1 + $0xb0] ss:$8 sps:$4 sm:$0xff]   ;;  %v3817_v58 = vld [vmem:[%s5780_s1 + $0xa4] ss:$8 sps:$4 sm:$0xff]   ;;  %v75_v12 = vpack.c.bf16 %v51_v7, %v27_v6 }
  0x14   :  { %2467 = vmatpush1.bf16.msra.mxu1 %v3768_v19  ;;  %2425 = vmatprep.subr.bf16.mxu0 %v3769_v20  ;;  %v3813_v55 = vld [vmem:[%s5780_s1 + $0x1b4] ss:$8 sps:$4 sm:$0xff]   ;;  %v3816_v57 = vld [vmem:[%s5780_s1 + $0x1b0] ss:$8 sps:$4 sm:$0xff]   ;;  %v3819_v59 = vld [vmem:[%s5780_s1 + $0x1a4] ss:$8 sps:$4 sm:$0xff]  }
  0x15   :  { %2468 = vmatprep.subr.bf16.mxu1 %v3771_v21  ;;  %2447 = vmatprep.mubr.bf16.mxu0 %v76_v53  ;;  %v3821_v60 = vld [vmem:[%s5780_s1 + $0xa0] ss:$8 sps:$4 sm:$0xff]   ;;  %v3823_v62 = vld [vmem:[%s5780_s1 + $0x94] ss:$8 sps:$4 sm:$0xff]   ;;  %v3827_v0 = vld [vmem:[%s5780_s1 + $0x90] ss:$8 sps:$4 sm:$0xff]  }
  0x16   :  { %2490 = vmatprep.mubr.bf16.mxu1 %v78_v54  ;;  %v3822_v61 = vld [vmem:[%s5780_s1 + $0x1a0] ss:$8 sps:$4 sm:$0xff]   ;;  %v3825_v63 = vld [vmem:[%s5780_s1 + $0x194] ss:$8 sps:$4 sm:$0xff]   ;;  %v3828_v1 = vld [vmem:[%s5780_s1 + $0x190] ss:$8 sps:$4 sm:$0xff]  }
  0x17   :  { %2426 = vmatpush1.bf16.msra.mxu0 %v3773_v22  ;;  %v3829_v2 = vld [vmem:[%s5780_s1 + $0x84] ss:$8 sps:$4 sm:$0xff]   ;;  %v3833_v4 = vld [vmem:[%s5780_s1 + $0x80] ss:$8 sps:$4 sm:$0xff]   ;;  %v29_v8 = vld [vmem:[%s5781_s0 + $0x10] sm:$0xff] }
  0x18   :  { %2469 = vmatpush1.bf16.msra.mxu1 %v3774_v23  ;;  %2427 = vmatprep.subr.bf16.mxu0 %v3775_v24  ;;  %v3831_v3 = vld [vmem:[%s5780_s1 + $0x184] ss:$8 sps:$4 sm:$0xff]   ;;  %v3834_v5 = vld [vmem:[%s5780_s1 + $0x180] ss:$8 sps:$4 sm:$0xff]   ;;  %v53_v9 = vld [vmem:[%s5781_s0 + $0xd0] sm:$0xff] }
  0x19   :  { %2470 = vmatprep.subr.bf16.mxu1 %v3777_v25  ;;  %v3837_v10 = vld [vmem:[%s5780_s1 + $0x274] ss:$8 sps:$4 sm:$0xff]   ;;  %v77_v13 = vpack.c.bf16 %v53_v9, %v29_v8  ;;  %v3835_v14 = vld [vmem:[%s5780_s1 + $0x270] ss:$8 sps:$4 sm:$0xff]   ;;  %v3843_v16 = vld [vmem:[%s5780_s1 + $0x264] ss:$8 sps:$4 sm:$0xff]  }
  0x1a   :  { %v3840_v11 = vld [vmem:[%s5780_s1 + $0x374] ss:$8 sps:$4 sm:$0xff]   ;;  %v3838_v15 = vld [vmem:[%s5780_s1 + $0x370] ss:$8 sps:$4 sm:$0xff]   ;;  %v3846_v17 = vld [vmem:[%s5780_s1 + $0x364] ss:$8 sps:$4 sm:$0xff]  }
  0x1b   :  { %2428 = vmatpush1.bf16.msra.mxu0 %v3779_v26  ;;  %v3841_v18 = vld [vmem:[%s5780_s1 + $0x260] ss:$8 sps:$4 sm:$0xff]   ;;  %v3849_v20 = vld [vmem:[%s5780_s1 + $0x254] ss:$8 sps:$4 sm:$0xff]   ;;  %v3847_v22 = vld [vmem:[%s5780_s1 + $0x250] ss:$8 sps:$4 sm:$0xff]  }
  0x1c   :  { %2471 = vmatpush1.bf16.msra.mxu1 %v3780_v27  ;;  %2429 = vmatprep.subr.bf16.mxu0 %v3781_v28  ;;  %v3844_v19 = vld [vmem:[%s5780_s1 + $0x360] ss:$8 sps:$4 sm:$0xff]   ;;  %v3852_v21 = vld [vmem:[%s5780_s1 + $0x354] ss:$8 sps:$4 sm:$0xff]   ;;  %v3850_v23 = vld [vmem:[%s5780_s1 + $0x350] ss:$8 sps:$4 sm:$0xff]  }
  0x1d   :  { %2472 = vmatprep.subr.bf16.mxu1 %v3783_v29  ;;  %v3855_v24 = vld [vmem:[%s5780_s1 + $0x244] ss:$8 sps:$4 sm:$0xff]   ;;  %v3853_v26 = vld [vmem:[%s5780_s1 + $0x240] ss:$8 sps:$4 sm:$0xff]   ;;  %v3861_v28 = vld [vmem:[%s5780_s1 + $0x234] ss:$8 sps:$4 sm:$0xff]  }
  0x1e   :  { %v3858_v25 = vld [vmem:[%s5780_s1 + $0x344] ss:$8 sps:$4 sm:$0xff]   ;;  %v3856_v27 = vld [vmem:[%s5780_s1 + $0x340] ss:$8 sps:$4 sm:$0xff]   ;;  %v3864_v29 = vld [vmem:[%s5780_s1 + $0x334] ss:$8 sps:$4 sm:$0xff]  }
  0x1f   :  { %2430 = vmatpush1.bf16.msra.mxu0 %v3785_v30  ;;  %v3859_v30 = vld [vmem:[%s5780_s1 + $0x230] ss:$8 sps:$4 sm:$0xff]   ;;  %v3877_v48 = vld [vmem:[%s5780_s1 + $0x200] ss:$8 sps:$4 sm:$0xff]   ;;  %v3891_v54 = vld [vmem:[%s5780_s1 + $0x2e4] ss:$8 sps:$4 sm:$0xff]  }
  0x20   :  { %2473 = vmatpush1.bf16.msra.mxu1 %v3786_v31  ;;  %2431 = vmatprep.subr.bf16.mxu0 %v3787_v32  ;;  %v3862_v31 = vld [vmem:[%s5780_s1 + $0x330] ss:$8 sps:$4 sm:$0xff]   ;;  %v3867_v32 = vld [vmem:[%s5780_s1 + $0x224] ss:$8 sps:$4 sm:$0xff]   ;;  %v3880_v49 = vld [vmem:[%s5780_s1 + $0x300] ss:$8 sps:$4 sm:$0xff]  }
  0x21   :  { %2474 = vmatprep.subr.bf16.mxu1 %v3789_v33  ;;  %v3870_v33 = vld [vmem:[%s5780_s1 + $0x324] ss:$8 sps:$4 sm:$0xff]   ;;  %v58_v46 = vld [vmem:[%s5781_s0 + $0xf8] sm:$0xff]  ;;  %v3913_v8 = vld [vmem:[%s5780_s1 + $0x2a0] ss:$8 sps:$4 sm:$0xff]  }
  0x22   :  { %v3886_v53 = vld [vmem:[%s5780_s1 + $0x3f0] ss:$8 sps:$4 sm:$0xff]   ;;  %v3915_v6 = vld [vmem:[%s5780_s1 + $0x2a4] ss:$8 sps:$4 sm:$0xff]   ;;  %v3916_v9 = vld [vmem:[%s5780_s1 + $0x3a0] ss:$8 sps:$4 sm:$0xff]  }
  0x23   :  { %2432 = vmatpush2.bf16.msra.mxu0 %v3791_v34  ;;  %v3865_v34 = vld [vmem:[%s5780_s1 + $0x220] ss:$8 sps:$4 sm:$0xff]   ;;  %v3918_v7 = vld [vmem:[%s5780_s1 + $0x3a4] ss:$8 sps:$4 sm:$0xff]  }
  0x24   :  { %2475 = vmatpush2.bf16.msra.mxu1 %v3792_v35  ;;  %2433 = vmatprep.subr.bf16.mxu0 %v3793_v36  ;;  %v3868_v35 = vld [vmem:[%s5780_s1 + $0x320] ss:$8 sps:$4 sm:$0xff]   ;;  %v3873_v36 = vld [vmem:[%s5780_s1 + $0x214] ss:$8 sps:$4 sm:$0xff]  }
  0x25   :  { %2476 = vmatprep.subr.bf16.mxu1 %v3795_v37  ;;  %v3876_v37 = vld [vmem:[%s5780_s1 + $0x314] ss:$8 sps:$4 sm:$0xff]  }
  0x27   :  { %2434 = vmatpush2.bf16.msra.mxu0 %v3797_v38  ;;  %v3871_v38 = vld [vmem:[%s5780_s1 + $0x210] ss:$8 sps:$4 sm:$0xff]  }
  0x28   :  { %2477 = vmatpush2.bf16.msra.mxu1 %v3798_v39  ;;  %2435 = vmatprep.subr.bf16.mxu0 %v3799_v40  ;;  %v3874_v39 = vld [vmem:[%s5780_s1 + $0x310] ss:$8 sps:$4 sm:$0xff]   ;;  %v32_v40 = vld [vmem:[%s5781_s0 + $0x28] sm:$0xff] }
  0x29   :  { %2478 = vmatprep.subr.bf16.mxu1 %v3801_v41  ;;  %v56_v41 = vld [vmem:[%s5781_s0 + $0xe8] sm:$0xff] }
  0x2b   :  { %2436 = vmatpush2.bf16.msra.mxu0 %v3803_v42  ;;  %v34_v42 = vld [vmem:[%s5781_s0 + $0x38] sm:$0xff] }
  0x2c   :  { %2479 = vmatpush2.bf16.msra.mxu1 %v3804_v43  ;;  %2437 = vmatprep.subr.bf16.mxu0 %v3805_v44  ;;  %v3879_v43 = vld [vmem:[%s5780_s1 + $0x204] ss:$8 sps:$4 sm:$0xff]   ;;  %v82_v47 = vpack.c.bf16 %v58_v46, %v34_v42  ;;  %v3957_v46 = vld [vmem:[%s5780_s1 + $0x434] ss:$8 sps:$4 sm:$0xff]  }
  0x2d   :  { %2480 = vmatprep.subr.bf16.mxu1 %v3807_v45  ;;  %v3882_v44 = vld [vmem:[%s5780_s1 + $0x304] ss:$8 sps:$4 sm:$0xff]   ;;  %v80_v45 = vpack.c.bf16 %v56_v41, %v32_v40  ;;  %v3946_v40 = vld [vmem:[%s5780_s1 + $0x550] ss:$8 sps:$4 sm:$0xff]  }
  0x2e   :  { %v3951_v42 = vld [vmem:[%s5780_s1 + $0x444] ss:$8 sps:$4 sm:$0xff]  }
  0x2f   :  { %2438 = vmatpush2.bf16.msra.mxu0 %v3809_v50  ;;  %v3885_v50 = vld [vmem:[%s5780_s1 + $0x2f4] ss:$8 sps:$4 sm:$0xff]  }
  0x30   :  { %2481 = vmatpush2.bf16.msra.mxu1 %v3810_v51  ;;  %2439 = vmatprep.subr.bf16.mxu0 %v3811_v52  ;;  %v3888_v51 = vld [vmem:[%s5780_s1 + $0x3f4] ss:$8 sps:$4 sm:$0xff]   ;;  %v3883_v52 = vld [vmem:[%s5780_s1 + $0x2f0] ss:$8 sps:$4 sm:$0xff]  }
  0x31   :  { %2482 = vmatprep.subr.bf16.mxu1 %v3813_v55  ;;  %v3894_v55 = vld [vmem:[%s5780_s1 + $0x3e4] ss:$8 sps:$4 sm:$0xff]  }
  0x33   :  { %2440 = vmatpush2.bf16.msra.mxu0 %v3815_v56  ;;  %v3889_v56 = vld [vmem:[%s5780_s1 + $0x2e0] ss:$8 sps:$4 sm:$0xff]  }
  0x34   :  { %2483 = vmatpush2.bf16.msra.mxu1 %v3816_v57  ;;  %2441 = vmatprep.subr.bf16.mxu0 %v3817_v58  ;;  %v3892_v57 = vld [vmem:[%s5780_s1 + $0x3e0] ss:$8 sps:$4 sm:$0xff]   ;;  %v3897_v58 = vld [vmem:[%s5780_s1 + $0x2d4] ss:$8 sps:$4 sm:$0xff]  }
  0x35   :  { %2484 = vmatprep.subr.bf16.mxu1 %v3819_v59  ;;  %v3900_v59 = vld [vmem:[%s5780_s1 + $0x3d4] ss:$8 sps:$4 sm:$0xff]  }
  0x37   :  { %2442 = vmatpush2.bf16.msra.mxu0 %v3821_v60  ;;  %v3895_v60 = vld [vmem:[%s5780_s1 + $0x2d0] ss:$8 sps:$4 sm:$0xff]  }
  0x38   :  { %2485 = vmatpush2.bf16.msra.mxu1 %v3822_v61  ;;  %2443 = vmatprep.subr.bf16.mxu0 %v3823_v62  ;;  %v3898_v61 = vld [vmem:[%s5780_s1 + $0x3d0] ss:$8 sps:$4 sm:$0xff]   ;;  %v3903_v62 = vld [vmem:[%s5780_s1 + $0x2c4] ss:$8 sps:$4 sm:$0xff]  }
  0x39   :  { %2486 = vmatprep.subr.bf16.mxu1 %v3825_v63  ;;  %v3906_v63 = vld [vmem:[%s5780_s1 + $0x3c4] ss:$8 sps:$4 sm:$0xff]  }
  0x3b   :  { %2444 = vmatpush2.bf16.msra.mxu0 %v3827_v0  ;;  %v3901_v0 = vld [vmem:[%s5780_s1 + $0x2c0] ss:$8 sps:$4 sm:$0xff]  }
  0x3c   :  { %2487 = vmatpush2.bf16.msra.mxu1 %v3828_v1  ;;  %2445 = vmatprep.subr.bf16.mxu0 %v3829_v2  ;;  %v3904_v1 = vld [vmem:[%s5780_s1 + $0x3c0] ss:$8 sps:$4 sm:$0xff]   ;;  %v3909_v2 = vld [vmem:[%s5780_s1 + $0x2b4] ss:$8 sps:$4 sm:$0xff]  }
  0x3d   :  { %2488 = vmatprep.subr.bf16.mxu1 %v3831_v3  ;;  %v3912_v3 = vld [vmem:[%s5780_s1 + $0x3b4] ss:$8 sps:$4 sm:$0xff]  }
  0x3f   :  { %2446 = vmatpush2.bf16.msra.mxu0 %v3833_v4  ;;  %v3907_v4 = vld [vmem:[%s5780_s1 + $0x2b0] ss:$8 sps:$4 sm:$0xff]  }
  0x40   :  { %2489 = vmatpush2.bf16.msra.mxu1 %v3834_v5  ;;  %2501 = vmatprep.subr.bf16.mxu0 %v3837_v10  ;;  %v3910_v5 = vld [vmem:[%s5780_s1 + $0x3b0] ss:$8 sps:$4 sm:$0xff]   ;;  %v3921_v10 = vld [vmem:[%s5780_s1 + $0x294] ss:$8 sps:$4 sm:$0xff]  }
  0x41   :  { %2544 = vmatprep.subr.bf16.mxu1 %v3840_v11  ;;  %v3924_v11 = vld [vmem:[%s5780_s1 + $0x394] ss:$8 sps:$4 sm:$0xff]  }
  0x42   :  { %2448 = vmatmul.mubr.bf16.vlgmr.msra.gmra.mxu0 %v75_v12  ;;  %v3919_v12 = vld [vmem:[%s5780_s1 + $0x290] ss:$8 sps:$4 sm:$0xff]  }
  0x43   :  { %2491 = vmatmul.mubr.bf16.vlgmr.msra.gmra.mxu1 %v77_v13  ;;  %2502 = vmatpush1.bf16.msra.mxu0 %v3835_v14  ;;  %v3922_v13 = vld [vmem:[%s5780_s1 + $0x390] ss:$8 sps:$4 sm:$0xff]   ;;  %v3927_v14 = vld [vmem:[%s5780_s1 + $0x284] ss:$8 sps:$4 sm:$0xff]  }
  0x44   :  { %2545 = vmatpush1.bf16.msra.mxu1 %v3838_v15  ;;  %2503 = vmatprep.subr.bf16.mxu0 %v3843_v16  ;;  %v3930_v15 = vld [vmem:[%s5780_s1 + $0x384] ss:$8 sps:$4 sm:$0xff]   ;;  %v3925_v16 = vld [vmem:[%s5780_s1 + $0x280] ss:$8 sps:$4 sm:$0xff]  }
  0x45   :  { %2546 = vmatprep.subr.bf16.mxu1 %v3846_v17  ;;  %2533 = vmatprep.mubr.bf16.mxu0 %v80_v45  ;;  %v3928_v17 = vld [vmem:[%s5780_s1 + $0x380] ss:$8 sps:$4 sm:$0xff]  }
  0x46   :  { %2576 = vmatprep.mubr.bf16.mxu1 %v82_v47  ;;  %v3952_v45 = vld [vmem:[%s5780_s1 + $0x540] ss:$8 sps:$4 sm:$0xff]   ;;  %v3960_v47 = vld [vmem:[%s5780_s1 + $0x534] ss:$8 sps:$4 sm:$0xff]  }
  0x47   :  { %2504 = vmatpush1.bf16.msra.mxu0 %v3841_v18  ;;  %v31_v18 = vld [vmem:[%s5781_s0 + $0x20] sm:$0xff] }
  0x48   :  { %2547 = vmatpush1.bf16.msra.mxu1 %v3844_v19  ;;  %2505 = vmatprep.subr.bf16.mxu0 %v3849_v20  ;;  %v55_v19 = vld [vmem:[%s5781_s0 + $0xe0] sm:$0xff]  ;;  %v33_v20 = vld [vmem:[%s5781_s0 + $0x30] sm:$0xff] }
  0x49   :  { %2548 = vmatprep.subr.bf16.mxu1 %v3852_v21  ;;  %v57_v21 = vld [vmem:[%s5781_s0 + $0xf0] sm:$0xff] }
  0x4b   :  { %2506 = vmatpush1.bf16.msra.mxu0 %v3847_v22  ;;  %v3933_v22 = vld [vmem:[%s5780_s1 + $0x474] ss:$8 sps:$4 sm:$0xff]  }
  0x4c   :  { %2549 = vmatpush1.bf16.msra.mxu1 %v3850_v23  ;;  %2507 = vmatprep.subr.bf16.mxu0 %v3855_v24  ;;  %v3936_v23 = vld [vmem:[%s5780_s1 + $0x574] ss:$8 sps:$4 sm:$0xff]   ;;  %v79_v24 = vpack.c.bf16 %v55_v19, %v31_v18  ;;  %v4011_v18 = vld [vmem:[%s5780_s1 + $0x4a4] ss:$8 sps:$4 sm:$0xff]  }
  0x4d   :  { %2550 = vmatprep.subr.bf16.mxu1 %v3858_v25  ;;  %v81_v25 = vpack.c.bf16 %v57_v21, %v33_v20  ;;  %v4014_v19 = vld [vmem:[%s5780_s1 + $0x5a4] ss:$8 sps:$4 sm:$0xff]   ;;  %v4009_v20 = vld [vmem:[%s5780_s1 + $0x4a0] ss:$8 sps:$4 sm:$0xff]  }
  0x4e   :  { %v4012_v21 = vld [vmem:[%s5780_s1 + $0x5a0] ss:$8 sps:$4 sm:$0xff]  }
  0x4f   :  { %2508 = vmatpush1.bf16.msra.mxu0 %v3853_v26  ;;  %v3931_v26 = vld [vmem:[%s5780_s1 + $0x470] ss:$8 sps:$4 sm:$0xff]  }
  0x50   :  { %2551 = vmatpush1.bf16.msra.mxu1 %v3856_v27  ;;  %2509 = vmatprep.subr.bf16.mxu0 %v3861_v28  ;;  %v3934_v27 = vld [vmem:[%s5780_s1 + $0x570] ss:$8 sps:$4 sm:$0xff]   ;;  %v3939_v28 = vld [vmem:[%s5780_s1 + $0x464] ss:$8 sps:$4 sm:$0xff]  }
  0x51   :  { %2552 = vmatprep.subr.bf16.mxu1 %v3864_v29  ;;  %v3942_v29 = vld [vmem:[%s5780_s1 + $0x564] ss:$8 sps:$4 sm:$0xff]  }
  0x53   :  { %2510 = vmatpush1.bf16.msra.mxu0 %v3859_v30  ;;  %v3937_v30 = vld [vmem:[%s5780_s1 + $0x460] ss:$8 sps:$4 sm:$0xff]  }
  0x54   :  { %2553 = vmatpush1.bf16.msra.mxu1 %v3862_v31  ;;  %2511 = vmatprep.subr.bf16.mxu0 %v3867_v32  ;;  %v3940_v31 = vld [vmem:[%s5780_s1 + $0x560] ss:$8 sps:$4 sm:$0xff]   ;;  %v3945_v32 = vld [vmem:[%s5780_s1 + $0x454] ss:$8 sps:$4 sm:$0xff]  }
  0x55   :  { %2554 = vmatprep.subr.bf16.mxu1 %v3870_v33  ;;  %v3948_v33 = vld [vmem:[%s5780_s1 + $0x554] ss:$8 sps:$4 sm:$0xff]  }
  0x57   :  { %2512 = vmatpush1.bf16.msra.mxu0 %v3865_v34  ;;  %v36_v34 = vld [vmem:[%s5781_s0 + $0x48] sm:$0xff] }
  0x58   :  { %2555 = vmatpush1.bf16.msra.mxu1 %v3868_v35  ;;  %2513 = vmatprep.subr.bf16.mxu0 %v3873_v36  ;;  %v60_v35 = vld [vmem:[%s5781_s0 + $0x108] sm:$0xff] }
  0x59   :  { %2556 = vmatprep.subr.bf16.mxu1 %v3876_v37  ;;  %v84_v36 = vpack.c.bf16 %v60_v35, %v36_v34  ;;  %v38_v37 = vld [vmem:[%s5781_s0 + $0x58] sm:$0xff] }
  0x5a   :  { %v4029_v34 = vld [vmem:[%s5780_s1 + $0x674] ss:$8 sps:$4 sm:$0xff]  }
  0x5b   :  { %2514 = vmatpush1.bf16.msra.mxu0 %v3871_v38  ;;  %v62_v38 = vld [vmem:[%s5781_s0 + $0x118] sm:$0xff] }
  0x5c   :  { %2557 = vmatpush1.bf16.msra.mxu1 %v3874_v39  ;;  %2515 = vmatprep.subr.bf16.mxu0 %v3879_v43  ;;  %v3943_v39 = vld [vmem:[%s5780_s1 + $0x450] ss:$8 sps:$4 sm:$0xff]   ;;  %v86_v41 = vpack.c.bf16 %v62_v38, %v38_v37  ;;  %v3954_v43 = vld [vmem:[%s5780_s1 + $0x544] ss:$8 sps:$4 sm:$0xff]   ;;  %v4032_v35 = vld [vmem:[%s5780_s1 + $0x774] ss:$8 sps:$4 sm:$0xff]  }
  0x5d   :  { %2558 = vmatprep.subr.bf16.mxu1 %v3882_v44  ;;  %v3949_v44 = vld [vmem:[%s5780_s1 + $0x440] ss:$8 sps:$4 sm:$0xff]   ;;  %v4027_v37 = vld [vmem:[%s5780_s1 + $0x670] ss:$8 sps:$4 sm:$0xff]  }
  0x5e   :  { %v64_v38 = vld [vmem:[%s5781_s0 + $0x128] sm:$0xff] }
  0x5f   :  { %2516 = vmatpush1.bf16.msra.mxu0 %v3877_v48  ;;  %v3955_v48 = vld [vmem:[%s5780_s1 + $0x430] ss:$8 sps:$4 sm:$0xff]  }
  0x60   :  { %2559 = vmatpush1.bf16.msra.mxu1 %v3880_v49  ;;  %2517 = vmatprep.subr.bf16.mxu0 %v3885_v50  ;;  %v3958_v49 = vld [vmem:[%s5780_s1 + $0x530] ss:$8 sps:$4 sm:$0xff]   ;;  %v3963_v50 = vld [vmem:[%s5780_s1 + $0x424] ss:$8 sps:$4 sm:$0xff]  }
  0x61   :  { %2560 = vmatprep.subr.bf16.mxu1 %v3888_v51  ;;  %v3966_v51 = vld [vmem:[%s5780_s1 + $0x524] ss:$8 sps:$4 sm:$0xff]  }
  0x63   :  { %2518 = vmatpush2.bf16.msra.mxu0 %v3883_v52  ;;  %v3961_v52 = vld [vmem:[%s5780_s1 + $0x420] ss:$8 sps:$4 sm:$0xff]  }
  0x64   :  { %2561 = vmatpush2.bf16.msra.mxu1 %v3886_v53  ;;  %2519 = vmatprep.subr.bf16.mxu0 %v3891_v54  ;;  %v3964_v53 = vld [vmem:[%s5780_s1 + $0x520] ss:$8 sps:$4 sm:$0xff]   ;;  %v3969_v54 = vld [vmem:[%s5780_s1 + $0x414] ss:$8 sps:$4 sm:$0xff]  }
  0x65   :  { %2562 = vmatprep.subr.bf16.mxu1 %v3894_v55  ;;  %v3972_v55 = vld [vmem:[%s5780_s1 + $0x514] ss:$8 sps:$4 sm:$0xff]  }
  0x67   :  { %2520 = vmatpush2.bf16.msra.mxu0 %v3889_v56  ;;  %v3967_v56 = vld [vmem:[%s5780_s1 + $0x410] ss:$8 sps:$4 sm:$0xff]  }
  0x68   :  { %2563 = vmatpush2.bf16.msra.mxu1 %v3892_v57  ;;  %2521 = vmatprep.subr.bf16.mxu0 %v3897_v58  ;;  %v3970_v57 = vld [vmem:[%s5780_s1 + $0x510] ss:$8 sps:$4 sm:$0xff]   ;;  %v3975_v58 = vld [vmem:[%s5780_s1 + $0x404] ss:$8 sps:$4 sm:$0xff]  }
  0x69   :  { %2564 = vmatprep.subr.bf16.mxu1 %v3900_v59  ;;  %v3978_v59 = vld [vmem:[%s5780_s1 + $0x504] ss:$8 sps:$4 sm:$0xff]  }
  0x6b   :  { %2522 = vmatpush2.bf16.msra.mxu0 %v3895_v60  ;;  %v3973_v60 = vld [vmem:[%s5780_s1 + $0x400] ss:$8 sps:$4 sm:$0xff]  }
  0x6c   :  { %2565 = vmatpush2.bf16.msra.mxu1 %v3898_v61  ;;  %2523 = vmatprep.subr.bf16.mxu0 %v3903_v62  ;;  %v3976_v61 = vld [vmem:[%s5780_s1 + $0x500] ss:$8 sps:$4 sm:$0xff]   ;;  %v3981_v62 = vld [vmem:[%s5780_s1 + $0x4f4] ss:$8 sps:$4 sm:$0xff]  }
  0x6d   :  { %2566 = vmatprep.subr.bf16.mxu1 %v3906_v63  ;;  %v3984_v63 = vld [vmem:[%s5780_s1 + $0x5f4] ss:$8 sps:$4 sm:$0xff]  }
  0x6f   :  { %2524 = vmatpush2.bf16.msra.mxu0 %v3901_v0  ;;  %v3979_v0 = vld [vmem:[%s5780_s1 + $0x4f0] ss:$8 sps:$4 sm:$0xff]  }
  0x70   :  { %2567 = vmatpush2.bf16.msra.mxu1 %v3904_v1  ;;  %2525 = vmatprep.subr.bf16.mxu0 %v3909_v2  ;;  %v3982_v1 = vld [vmem:[%s5780_s1 + $0x5f0] ss:$8 sps:$4 sm:$0xff]   ;;  %v3987_v2 = vld [vmem:[%s5780_s1 + $0x4e4] ss:$8 sps:$4 sm:$0xff]  }
  0x71   :  { %2568 = vmatprep.subr.bf16.mxu1 %v3912_v3  ;;  %v3990_v3 = vld [vmem:[%s5780_s1 + $0x5e4] ss:$8 sps:$4 sm:$0xff]  }
  0x73   :  { %2526 = vmatpush2.bf16.msra.mxu0 %v3907_v4  ;;  %v3985_v4 = vld [vmem:[%s5780_s1 + $0x4e0] ss:$8 sps:$4 sm:$0xff]  }
  0x74   :  { %2569 = vmatpush2.bf16.msra.mxu1 %v3910_v5  ;;  %2527 = vmatprep.subr.bf16.mxu0 %v3915_v6  ;;  %v3988_v5 = vld [vmem:[%s5780_s1 + $0x5e0] ss:$8 sps:$4 sm:$0xff]   ;;  %v3993_v6 = vld [vmem:[%s5780_s1 + $0x4d4] ss:$8 sps:$4 sm:$0xff]  }
  0x75   :  { %2570 = vmatprep.subr.bf16.mxu1 %v3918_v7  ;;  %v3996_v7 = vld [vmem:[%s5780_s1 + $0x5d4] ss:$8 sps:$4 sm:$0xff]  }
  0x77   :  { %2528 = vmatpush2.bf16.msra.mxu0 %v3913_v8  ;;  %v3991_v8 = vld [vmem:[%s5780_s1 + $0x4d0] ss:$8 sps:$4 sm:$0xff]  }
  0x78   :  { %2571 = vmatpush2.bf16.msra.mxu1 %v3916_v9  ;;  %2529 = vmatprep.subr.bf16.mxu0 %v3921_v10  ;;  %v3994_v9 = vld [vmem:[%s5780_s1 + $0x5d0] ss:$8 sps:$4 sm:$0xff]   ;;  %v3999_v10 = vld [vmem:[%s5780_s1 + $0x4c4] ss:$8 sps:$4 sm:$0xff]  }
  0x79   :  { %2572 = vmatprep.subr.bf16.mxu1 %v3924_v11  ;;  %v4002_v11 = vld [vmem:[%s5780_s1 + $0x5c4] ss:$8 sps:$4 sm:$0xff]  }
  0x7b   :  { %2530 = vmatpush2.bf16.msra.mxu0 %v3919_v12  ;;  %v3997_v12 = vld [vmem:[%s5780_s1 + $0x4c0] ss:$8 sps:$4 sm:$0xff]  }
  0x7c   :  { %2573 = vmatpush2.bf16.msra.mxu1 %v3922_v13  ;;  %2531 = vmatprep.subr.bf16.mxu0 %v3927_v14  ;;  %v4000_v13 = vld [vmem:[%s5780_s1 + $0x5c0] ss:$8 sps:$4 sm:$0xff]   ;;  %v4005_v14 = vld [vmem:[%s5780_s1 + $0x4b4] ss:$8 sps:$4 sm:$0xff]  }
  0x7d   :  { %2574 = vmatprep.subr.bf16.mxu1 %v3930_v15  ;;  %v4008_v15 = vld [vmem:[%s5780_s1 + $0x5b4] ss:$8 sps:$4 sm:$0xff]  }
  0x7f   :  { %2532 = vmatpush2.bf16.msra.mxu0 %v3925_v16  ;;  %v4003_v16 = vld [vmem:[%s5780_s1 + $0x4b0] ss:$8 sps:$4 sm:$0xff]  }
  0x80   :  { %2575 = vmatpush2.bf16.msra.mxu1 %v3928_v17  ;;  %2587 = vmatprep.subr.bf16.mxu0 %v3933_v22  ;;  %v4006_v17 = vld [vmem:[%s5780_s1 + $0x5b0] ss:$8 sps:$4 sm:$0xff]   ;;  %v4017_v22 = vld [vmem:[%s5780_s1 + $0x494] ss:$8 sps:$4 sm:$0xff]  }
  0x81   :  { %2630 = vmatprep.subr.bf16.mxu1 %v3936_v23  ;;  %v4020_v23 = vld [vmem:[%s5780_s1 + $0x594] ss:$8 sps:$4 sm:$0xff]  }
  0x82   :  { %2534 = vmatmul.mubr.bf16.vlgmr.msra.gmra.mxu0 %v79_v24  ;;  %v4015_v24 = vld [vmem:[%s5780_s1 + $0x490] ss:$8 sps:$4 sm:$0xff]  }
  0x83   :  { %2577 = vmatmul.mubr.bf16.vlgmr.msra.gmra.mxu1 %v81_v25  ;;  %2588 = vmatpush1.bf16.msra.mxu0 %v3931_v26  ;;  %v4018_v25 = vld [vmem:[%s5780_s1 + $0x590] ss:$8 sps:$4 sm:$0xff]   ;;  %v4023_v26 = vld [vmem:[%s5780_s1 + $0x484] ss:$8 sps:$4 sm:$0xff]  }
  0x84   :  { %2631 = vmatpush1.bf16.msra.mxu1 %v3934_v27  ;;  %2589 = vmatprep.subr.bf16.mxu0 %v3939_v28  ;;  %v4026_v27 = vld [vmem:[%s5780_s1 + $0x584] ss:$8 sps:$4 sm:$0xff]   ;;  %v4021_v28 = vld [vmem:[%s5780_s1 + $0x480] ss:$8 sps:$4 sm:$0xff]  }
  0x85   :  { %2632 = vmatprep.subr.bf16.mxu1 %v3942_v29  ;;  %2619 = vmatprep.mubr.bf16.mxu0 %v84_v36  ;;  %v4024_v29 = vld [vmem:[%s5780_s1 + $0x580] ss:$8 sps:$4 sm:$0xff]  }
  0x86   :  { %2662 = vmatprep.mubr.bf16.mxu1 %v86_v41  ;;  %v40_v36 = vld [vmem:[%s5781_s0 + $0x68] sm:$0xff] }
  0x87   :  { %2590 = vmatpush1.bf16.msra.mxu0 %v3937_v30  ;;  %v35_v30 = vld [vmem:[%s5781_s0 + $0x40] sm:$0xff] }
  0x88   :  { %2633 = vmatpush1.bf16.msra.mxu1 %v3940_v31  ;;  %2591 = vmatprep.subr.bf16.mxu0 %v3945_v32  ;;  %v59_v31 = vld [vmem:[%s5781_s0 + $0x100] sm:$0xff]  ;;  %v37_v32 = vld [vmem:[%s5781_s0 + $0x50] sm:$0xff] }
  0x89   :  { %2634 = vmatprep.subr.bf16.mxu1 %v3948_v33  ;;  %v61_v33 = vld [vmem:[%s5781_s0 + $0x110] sm:$0xff] }
  0x8a   :  { %v85_v41 = vpack.c.bf16 %v61_v33, %v37_v32  ;;  %v4105_v32 = vld [vmem:[%s5780_s1 + $0x6a0] ss:$8 sps:$4 sm:$0xff]  }
  0x8b   :  { %2592 = vmatpush1.bf16.msra.mxu0 %v3943_v39  ;;  %v42_v39 = vld [vmem:[%s5781_s0 + $0x78] sm:$0xff]  ;;  %v4108_v33 = vld [vmem:[%s5780_s1 + $0x7a0] ss:$8 sps:$4 sm:$0xff]  }
  0x8c   :  { %2635 = vmatpush1.bf16.msra.mxu1 %v3946_v40  ;;  %2593 = vmatprep.subr.bf16.mxu0 %v3951_v42  ;;  %v83_v40 = vpack.c.bf16 %v59_v31, %v35_v30  ;;  %v66_v42 = vld [vmem:[%s5781_s0 + $0x138] sm:$0xff]  ;;  %v4107_v30 = vld [vmem:[%s5780_s1 + $0x6a4] ss:$8 sps:$4 sm:$0xff]  }
  0x8d   :  { %2636 = vmatprep.subr.bf16.mxu1 %v3954_v43  ;;  %v4030_v43 = vld [vmem:[%s5780_s1 + $0x770] ss:$8 sps:$4 sm:$0xff]   ;;  %v4110_v31 = vld [vmem:[%s5780_s1 + $0x7a4] ss:$8 sps:$4 sm:$0xff]  }
  0x8f   :  { %2594 = vmatpush1.bf16.msra.mxu0 %v3949_v44  ;;  %v4035_v44 = vld [vmem:[%s5780_s1 + $0x664] ss:$8 sps:$4 sm:$0xff]  }
  0x90   :  { %2637 = vmatpush1.bf16.msra.mxu1 %v3952_v45  ;;  %2595 = vmatprep.subr.bf16.mxu0 %v3957_v46  ;;  %v4038_v45 = vld [vmem:[%s5780_s1 + $0x764] ss:$8 sps:$4 sm:$0xff]   ;;  %v88_v46 = vpack.c.bf16 %v64_v38, %v40_v36  ;;  %v4111_v36 = vld [vmem:[%s5780_s1 + $0x690] ss:$8 sps:$4 sm:$0xff]  }
  0x91   :  { %2638 = vmatprep.subr.bf16.mxu1 %v3960_v47  ;;  %v90_v47 = vpack.c.bf16 %v66_v42, %v42_v39  ;;  %v4119_v38 = vld [vmem:[%s5780_s1 + $0x684] ss:$8 sps:$4 sm:$0xff]  }
  0x92   :  { %v4122_v39 = vld [vmem:[%s5780_s1 + $0x784] ss:$8 sps:$4 sm:$0xff]  }
  0x93   :  { %2596 = vmatpush1.bf16.msra.mxu0 %v3955_v48  ;;  %v4033_v48 = vld [vmem:[%s5780_s1 + $0x660] ss:$8 sps:$4 sm:$0xff]  }
  0x94   :  { %2639 = vmatpush1.bf16.msra.mxu1 %v3958_v49  ;;  %2597 = vmatprep.subr.bf16.mxu0 %v3963_v50  ;;  %v4036_v49 = vld [vmem:[%s5780_s1 + $0x760] ss:$8 sps:$4 sm:$0xff]   ;;  %v4041_v50 = vld [vmem:[%s5780_s1 + $0x654] ss:$8 sps:$4 sm:$0xff]  }
  0x95   :  { %2640 = vmatprep.subr.bf16.mxu1 %v3966_v51  ;;  %v4044_v51 = vld [vmem:[%s5780_s1 + $0x754] ss:$8 sps:$4 sm:$0xff]   ;;  %v39_v42 = vld [vmem:[%s5781_s0 + $0x60] sm:$0xff] }
  0x97   :  { %2598 = vmatpush1.bf16.msra.mxu0 %v3961_v52  ;;  %v4039_v52 = vld [vmem:[%s5780_s1 + $0x650] ss:$8 sps:$4 sm:$0xff]  }
  0x98   :  { %2641 = vmatpush1.bf16.msra.mxu1 %v3964_v53  ;;  %2599 = vmatprep.subr.bf16.mxu0 %v3969_v54  ;;  %v4042_v53 = vld [vmem:[%s5780_s1 + $0x750] ss:$8 sps:$4 sm:$0xff]   ;;  %v4047_v54 = vld [vmem:[%s5780_s1 + $0x644] ss:$8 sps:$4 sm:$0xff]  }
  0x99   :  { %2642 = vmatprep.subr.bf16.mxu1 %v3972_v55  ;;  %v4050_v55 = vld [vmem:[%s5780_s1 + $0x744] ss:$8 sps:$4 sm:$0xff]  }
  0x9b   :  { %2600 = vmatpush1.bf16.msra.mxu0 %v3967_v56  ;;  %v4045_v56 = vld [vmem:[%s5780_s1 + $0x640] ss:$8 sps:$4 sm:$0xff]  }
  0x9c   :  { %2643 = vmatpush1.bf16.msra.mxu1 %v3970_v57  ;;  %2601 = vmatprep.subr.bf16.mxu0 %v3975_v58  ;;  %v4048_v57 = vld [vmem:[%s5780_s1 + $0x740] ss:$8 sps:$4 sm:$0xff]   ;;  %v4053_v58 = vld [vmem:[%s5780_s1 + $0x634] ss:$8 sps:$4 sm:$0xff]  }
  0x9d   :  { %2644 = vmatprep.subr.bf16.mxu1 %v3978_v59  ;;  %v4056_v59 = vld [vmem:[%s5780_s1 + $0x734] ss:$8 sps:$4 sm:$0xff]  }
  0x9f   :  { %2602 = vmatpush1.bf16.msra.mxu0 %v3973_v60  ;;  %v4051_v60 = vld [vmem:[%s5780_s1 + $0x630] ss:$8 sps:$4 sm:$0xff]  }
  0xa0   :  { %2645 = vmatpush1.bf16.msra.mxu1 %v3976_v61  ;;  %2603 = vmatprep.subr.bf16.mxu0 %v3981_v62  ;;  %v4054_v61 = vld [vmem:[%s5780_s1 + $0x730] ss:$8 sps:$4 sm:$0xff]   ;;  %v4059_v62 = vld [vmem:[%s5780_s1 + $0x624] ss:$8 sps:$4 sm:$0xff]  }
  0xa1   :  { %2646 = vmatprep.subr.bf16.mxu1 %v3984_v63  ;;  %v4062_v63 = vld [vmem:[%s5780_s1 + $0x724] ss:$8 sps:$4 sm:$0xff]  }
  0xa3   :  { %2604 = vmatpush2.bf16.msra.mxu0 %v3979_v0  ;;  %v4057_v0 = vld [vmem:[%s5780_s1 + $0x620] ss:$8 sps:$4 sm:$0xff]  }
  0xa4   :  { %2647 = vmatpush2.bf16.msra.mxu1 %v3982_v1  ;;  %2605 = vmatprep.subr.bf16.mxu0 %v3987_v2  ;;  %v4060_v1 = vld [vmem:[%s5780_s1 + $0x720] ss:$8 sps:$4 sm:$0xff]   ;;  %v4065_v2 = vld [vmem:[%s5780_s1 + $0x614] ss:$8 sps:$4 sm:$0xff]  }
  0xa5   :  { %2648 = vmatprep.subr.bf16.mxu1 %v3990_v3  ;;  %v4068_v3 = vld [vmem:[%s5780_s1 + $0x714] ss:$8 sps:$4 sm:$0xff]  }
  0xa7   :  { %2606 = vmatpush2.bf16.msra.mxu0 %v3985_v4  ;;  %v4063_v4 = vld [vmem:[%s5780_s1 + $0x610] ss:$8 sps:$4 sm:$0xff]  }
  0xa8   :  { %2649 = vmatpush2.bf16.msra.mxu1 %v3988_v5  ;;  %2607 = vmatprep.subr.bf16.mxu0 %v3993_v6  ;;  %v4066_v5 = vld [vmem:[%s5780_s1 + $0x710] ss:$8 sps:$4 sm:$0xff]   ;;  %v4071_v6 = vld [vmem:[%s5780_s1 + $0x604] ss:$8 sps:$4 sm:$0xff]  }
  0xa9   :  { %2650 = vmatprep.subr.bf16.mxu1 %v3996_v7  ;;  %v4074_v7 = vld [vmem:[%s5780_s1 + $0x704] ss:$8 sps:$4 sm:$0xff]  }
  0xab   :  { %2608 = vmatpush2.bf16.msra.mxu0 %v3991_v8  ;;  %v4069_v8 = vld [vmem:[%s5780_s1 + $0x600] ss:$8 sps:$4 sm:$0xff]  }
  0xac   :  { %2651 = vmatpush2.bf16.msra.mxu1 %v3994_v9  ;;  %2609 = vmatprep.subr.bf16.mxu0 %v3999_v10  ;;  %v4072_v9 = vld [vmem:[%s5780_s1 + $0x700] ss:$8 sps:$4 sm:$0xff]   ;;  %v4077_v10 = vld [vmem:[%s5780_s1 + $0x6f4] ss:$8 sps:$4 sm:$0xff]  }
  0xad   :  { %2652 = vmatprep.subr.bf16.mxu1 %v4002_v11  ;;  %v4080_v11 = vld [vmem:[%s5780_s1 + $0x7f4] ss:$8 sps:$4 sm:$0xff]  }
  0xaf   :  { %2610 = vmatpush2.bf16.msra.mxu0 %v3997_v12  ;;  %v4075_v12 = vld [vmem:[%s5780_s1 + $0x6f0] ss:$8 sps:$4 sm:$0xff]  }
  0xb0   :  { %2653 = vmatpush2.bf16.msra.mxu1 %v4000_v13  ;;  %2611 = vmatprep.subr.bf16.mxu0 %v4005_v14  ;;  %v4078_v13 = vld [vmem:[%s5780_s1 + $0x7f0] ss:$8 sps:$4 sm:$0xff]   ;;  %v4083_v14 = vld [vmem:[%s5780_s1 + $0x6e4] ss:$8 sps:$4 sm:$0xff]  }
  0xb1   :  { %2654 = vmatprep.subr.bf16.mxu1 %v4008_v15  ;;  %v4086_v15 = vld [vmem:[%s5780_s1 + $0x7e4] ss:$8 sps:$4 sm:$0xff]  }
  0xb3   :  { %2612 = vmatpush2.bf16.msra.mxu0 %v4003_v16  ;;  %v4081_v16 = vld [vmem:[%s5780_s1 + $0x6e0] ss:$8 sps:$4 sm:$0xff]  }
  0xb4   :  { %2655 = vmatpush2.bf16.msra.mxu1 %v4006_v17  ;;  %2613 = vmatprep.subr.bf16.mxu0 %v4011_v18  ;;  %v4084_v17 = vld [vmem:[%s5780_s1 + $0x7e0] ss:$8 sps:$4 sm:$0xff]   ;;  %v4089_v18 = vld [vmem:[%s5780_s1 + $0x6d4] ss:$8 sps:$4 sm:$0xff]  }
  0xb5   :  { %2656 = vmatprep.subr.bf16.mxu1 %v4014_v19  ;;  %v4092_v19 = vld [vmem:[%s5780_s1 + $0x7d4] ss:$8 sps:$4 sm:$0xff]  }
  0xb7   :  { %2614 = vmatpush2.bf16.msra.mxu0 %v4009_v20  ;;  %v4087_v20 = vld [vmem:[%s5780_s1 + $0x6d0] ss:$8 sps:$4 sm:$0xff]  }
  0xb8   :  { %2657 = vmatpush2.bf16.msra.mxu1 %v4012_v21  ;;  %2615 = vmatprep.subr.bf16.mxu0 %v4017_v22  ;;  %v4090_v21 = vld [vmem:[%s5780_s1 + $0x7d0] ss:$8 sps:$4 sm:$0xff]   ;;  %v4095_v22 = vld [vmem:[%s5780_s1 + $0x6c4] ss:$8 sps:$4 sm:$0xff]  }
  0xb9   :  { %2658 = vmatprep.subr.bf16.mxu1 %v4020_v23  ;;  %v4098_v23 = vld [vmem:[%s5780_s1 + $0x7c4] ss:$8 sps:$4 sm:$0xff]  }
  0xbb   :  { %2616 = vmatpush2.bf16.msra.mxu0 %v4015_v24  ;;  %v4093_v24 = vld [vmem:[%s5780_s1 + $0x6c0] ss:$8 sps:$4 sm:$0xff]  }
  0xbc   :  { %2659 = vmatpush2.bf16.msra.mxu1 %v4018_v25  ;;  %2617 = vmatprep.subr.bf16.mxu0 %v4023_v26  ;;  %v4096_v25 = vld [vmem:[%s5780_s1 + $0x7c0] ss:$8 sps:$4 sm:$0xff]   ;;  %v4101_v26 = vld [vmem:[%s5780_s1 + $0x6b4] ss:$8 sps:$4 sm:$0xff]  }
  0xbd   :  { %2660 = vmatprep.subr.bf16.mxu1 %v4026_v27  ;;  %v4104_v27 = vld [vmem:[%s5780_s1 + $0x7b4] ss:$8 sps:$4 sm:$0xff]  }
  0xbf   :  { %2618 = vmatpush2.bf16.msra.mxu0 %v4021_v28  ;;  %v4099_v28 = vld [vmem:[%s5780_s1 + $0x6b0] ss:$8 sps:$4 sm:$0xff]  }
  0xc0   :  { %2661 = vmatpush2.bf16.msra.mxu1 %v4024_v29  ;;  %2673 = vmatprep.subr.bf16.mxu0 %v4029_v34  ;;  %v4102_v29 = vld [vmem:[%s5780_s1 + $0x7b0] ss:$8 sps:$4 sm:$0xff]   ;;  %v4113_v34 = vld [vmem:[%s5780_s1 + $0x694] ss:$8 sps:$4 sm:$0xff]  }
  0xc1   :  { %2716 = vmatprep.subr.bf16.mxu1 %v4032_v35  ;;  %v4116_v35 = vld [vmem:[%s5780_s1 + $0x794] ss:$8 sps:$4 sm:$0xff]  }
  0xc2   :  { %2620 = vmatmul.mubr.bf16.vlgmr.msra.gmra.mxu0 %v83_v40  ;;  %v4117_v40 = vld [vmem:[%s5780_s1 + $0x680] ss:$8 sps:$4 sm:$0xff]  }
  0xc3   :  { %2663 = vmatmul.mubr.bf16.vlgmr.msra.gmra.mxu1 %v85_v41  ;;  %2674 = vmatpush1.bf16.msra.mxu0 %v4027_v37  ;;  %v4114_v37 = vld [vmem:[%s5780_s1 + $0x790] ss:$8 sps:$4 sm:$0xff]   ;;  %v4120_v41 = vld [vmem:[%s5780_s1 + $0x780] ss:$8 sps:$4 sm:$0xff]  }
  0xc4   :  { %2717 = vmatpush1.bf16.msra.mxu1 %v4030_v43  ;;  %2675 = vmatprep.subr.bf16.mxu0 %v4035_v44  ;;  %v63_v43 = vld [vmem:[%s5781_s0 + $0x120] sm:$0xff]  ;;  %v41_v44 = vld [vmem:[%s5781_s0 + $0x70] sm:$0xff] }
  0xc5   :  { %2718 = vmatprep.subr.bf16.mxu1 %v4038_v45  ;;  %2705 = vmatprep.mubr.bf16.mxu0 %v88_v46  ;;  %v65_v45 = vld [vmem:[%s5781_s0 + $0x130] sm:$0xff] }
  0xc6   :  { %2748 = vmatprep.mubr.bf16.mxu1 %v90_v47  ;;  %v4125_v46 = vld [vmem:[%s5780_s1 + $0x874] ss:$8 sps:$4 sm:$0xff]  }
  0xc7   :  { %2676 = vmatpush1.bf16.msra.mxu0 %v4033_v48  ;;  %v4128_v47 = vld [vmem:[%s5780_s1 + $0x974] ss:$8 sps:$4 sm:$0xff]   ;;  %v44_v48 = vld [vmem:[%s5781_s0 + $0x88] sm:$0xff] }
  0xc8   :  { %2719 = vmatpush1.bf16.msra.mxu1 %v4036_v49  ;;  %2677 = vmatprep.subr.bf16.mxu0 %v4041_v50  ;;  %v4123_v49 = vld [vmem:[%s5780_s1 + $0x870] ss:$8 sps:$4 sm:$0xff]   ;;  %v68_v50 = vld [vmem:[%s5781_s0 + $0x148] sm:$0xff] }
  0xc9   :  { %2720 = vmatprep.subr.bf16.mxu1 %v4044_v51  ;;  %v46_v51 = vld [vmem:[%s5781_s0 + $0x98] sm:$0xff] }
  0xcb   :  { %2678 = vmatpush1.bf16.msra.mxu0 %v4039_v52  ;;  %v87_v52 = vpack.c.bf16 %v63_v43, %v39_v42  ;;  %v4203_v42 = vld [vmem:[%s5780_s1 + $0x8a4] ss:$8 sps:$4 sm:$0xff]  }
  0xcc   :  { %2721 = vmatpush1.bf16.msra.mxu1 %v4042_v53  ;;  %2679 = vmatprep.subr.bf16.mxu0 %v4047_v54  ;;  %v89_v53 = vpack.c.bf16 %v65_v45, %v41_v44  ;;  %v70_v54 = vld [vmem:[%s5781_s0 + $0x158] sm:$0xff]  ;;  %v4206_v43 = vld [vmem:[%s5780_s1 + $0x9a4] ss:$8 sps:$4 sm:$0xff]   ;;  %v4201_v44 = vld [vmem:[%s5780_s1 + $0x8a0] ss:$8 sps:$4 sm:$0xff]  }
  0xcd   :  { %2722 = vmatprep.subr.bf16.mxu1 %v4050_v55  ;;  %v4126_v55 = vld [vmem:[%s5780_s1 + $0x970] ss:$8 sps:$4 sm:$0xff]   ;;  %v4204_v45 = vld [vmem:[%s5780_s1 + $0x9a0] ss:$8 sps:$4 sm:$0xff]  }
  0xcf   :  { %2680 = vmatpush1.bf16.msra.mxu0 %v4045_v56  ;;  %v4131_v56 = vld [vmem:[%s5780_s1 + $0x864] ss:$8 sps:$4 sm:$0xff]  }
  0xd0   :  { %2723 = vmatpush1.bf16.msra.mxu1 %v4048_v57  ;;  %2681 = vmatprep.subr.bf16.mxu0 %v4053_v58  ;;  %v4134_v57 = vld [vmem:[%s5780_s1 + $0x964] ss:$8 sps:$4 sm:$0xff]   ;;  %v92_v58 = vpack.c.bf16 %v68_v50, %v44_v48  ;;  %v4207_v48 = vld [vmem:[%s5780_s1 + $0x890] ss:$8 sps:$4 sm:$0xff]  }
  0xd1   :  { %2724 = vmatprep.subr.bf16.mxu1 %v4056_v59  ;;  %v94_v59 = vpack.c.bf16 %v70_v54, %v46_v51  ;;  %v4215_v50 = vld [vmem:[%s5780_s1 + $0x884] ss:$8 sps:$4 sm:$0xff]  }
  0xd2   :  { %v4218_v51 = vld [vmem:[%s5780_s1 + $0x984] ss:$8 sps:$4 sm:$0xff]  }
  0xd3   :  { %2682 = vmatpush1.bf16.msra.mxu0 %v4051_v60  ;;  %v4129_v60 = vld [vmem:[%s5780_s1 + $0x860] ss:$8 sps:$4 sm:$0xff]  }
  0xd4   :  { %2725 = vmatpush1.bf16.msra.mxu1 %v4054_v61  ;;  %2683 = vmatprep.subr.bf16.mxu0 %v4059_v62  ;;  %v4132_v61 = vld [vmem:[%s5780_s1 + $0x960] ss:$8 sps:$4 sm:$0xff]   ;;  %v4137_v62 = vld [vmem:[%s5780_s1 + $0x854] ss:$8 sps:$4 sm:$0xff]  }
  0xd5   :  { %2726 = vmatprep.subr.bf16.mxu1 %v4062_v63  ;;  %v4140_v63 = vld [vmem:[%s5780_s1 + $0x954] ss:$8 sps:$4 sm:$0xff]   ;;  %v43_v54 = vld [vmem:[%s5781_s0 + $0x80] sm:$0xff] }
  0xd7   :  { %2684 = vmatpush1.bf16.msra.mxu0 %v4057_v0  ;;  %v4135_v0 = vld [vmem:[%s5780_s1 + $0x850] ss:$8 sps:$4 sm:$0xff]  }
  0xd8   :  { %2727 = vmatpush1.bf16.msra.mxu1 %v4060_v1  ;;  %2685 = vmatprep.subr.bf16.mxu0 %v4065_v2  ;;  %v4138_v1 = vld [vmem:[%s5780_s1 + $0x950] ss:$8 sps:$4 sm:$0xff]   ;;  %v4143_v2 = vld [vmem:[%s5780_s1 + $0x844] ss:$8 sps:$4 sm:$0xff]  }
  0xd9   :  { %2728 = vmatprep.subr.bf16.mxu1 %v4068_v3  ;;  %v4146_v3 = vld [vmem:[%s5780_s1 + $0x944] ss:$8 sps:$4 sm:$0xff]  }
  0xdb   :  { %2686 = vmatpush1.bf16.msra.mxu0 %v4063_v4  ;;  %v4141_v4 = vld [vmem:[%s5780_s1 + $0x840] ss:$8 sps:$4 sm:$0xff]  }
  0xdc   :  { %2729 = vmatpush1.bf16.msra.mxu1 %v4066_v5  ;;  %2687 = vmatprep.subr.bf16.mxu0 %v4071_v6  ;;  %v4144_v5 = vld [vmem:[%s5780_s1 + $0x940] ss:$8 sps:$4 sm:$0xff]   ;;  %v4149_v6 = vld [vmem:[%s5780_s1 + $0x834] ss:$8 sps:$4 sm:$0xff]  }
  0xdd   :  { %2730 = vmatprep.subr.bf16.mxu1 %v4074_v7  ;;  %v4152_v7 = vld [vmem:[%s5780_s1 + $0x934] ss:$8 sps:$4 sm:$0xff]  }
  0xdf   :  { %2688 = vmatpush1.bf16.msra.mxu0 %v4069_v8  ;;  %v4147_v8 = vld [vmem:[%s5780_s1 + $0x830] ss:$8 sps:$4 sm:$0xff]  }
  0xe0   :  { %2731 = vmatpush1.bf16.msra.mxu1 %v4072_v9  ;;  %2689 = vmatprep.subr.bf16.mxu0 %v4077_v10  ;;  %v4150_v9 = vld [vmem:[%s5780_s1 + $0x930] ss:$8 sps:$4 sm:$0xff]   ;;  %v4155_v10 = vld [vmem:[%s5780_s1 + $0x824] ss:$8 sps:$4 sm:$0xff]  }
  0xe1   :  { %2732 = vmatprep.subr.bf16.mxu1 %v4080_v11  ;;  %v4158_v11 = vld [vmem:[%s5780_s1 + $0x924] ss:$8 sps:$4 sm:$0xff]  }
  0xe3   :  { %2690 = vmatpush2.bf16.msra.mxu0 %v4075_v12  ;;  %v4153_v12 = vld [vmem:[%s5780_s1 + $0x820] ss:$8 sps:$4 sm:$0xff]  }
  0xe4   :  { %2733 = vmatpush2.bf16.msra.mxu1 %v4078_v13  ;;  %2691 = vmatprep.subr.bf16.mxu0 %v4083_v14  ;;  %v4156_v13 = vld [vmem:[%s5780_s1 + $0x920] ss:$8 sps:$4 sm:$0xff]   ;;  %v4161_v14 = vld [vmem:[%s5780_s1 + $0x814] ss:$8 sps:$4 sm:$0xff]  }
  0xe5   :  { %2734 = vmatprep.subr.bf16.mxu1 %v4086_v15  ;;  %v4164_v15 = vld [vmem:[%s5780_s1 + $0x914] ss:$8 sps:$4 sm:$0xff]  }
  0xe7   :  { %2692 = vmatpush2.bf16.msra.mxu0 %v4081_v16  ;;  %v4159_v16 = vld [vmem:[%s5780_s1 + $0x810] ss:$8 sps:$4 sm:$0xff]  }
  0xe8   :  { %2735 = vmatpush2.bf16.msra.mxu1 %v4084_v17  ;;  %2693 = vmatprep.subr.bf16.mxu0 %v4089_v18  ;;  %v4162_v17 = vld [vmem:[%s5780_s1 + $0x910] ss:$8 sps:$4 sm:$0xff]   ;;  %v4167_v18 = vld [vmem:[%s5780_s1 + $0x804] ss:$8 sps:$4 sm:$0xff]  }
  0xe9   :  { %2736 = vmatprep.subr.bf16.mxu1 %v4092_v19  ;;  %v4170_v19 = vld [vmem:[%s5780_s1 + $0x904] ss:$8 sps:$4 sm:$0xff]  }
  0xeb   :  { %2694 = vmatpush2.bf16.msra.mxu0 %v4087_v20  ;;  %v4165_v20 = vld [vmem:[%s5780_s1 + $0x800] ss:$8 sps:$4 sm:$0xff]  }
  0xec   :  { %2737 = vmatpush2.bf16.msra.mxu1 %v4090_v21  ;;  %2695 = vmatprep.subr.bf16.mxu0 %v4095_v22  ;;  %v4168_v21 = vld [vmem:[%s5780_s1 + $0x900] ss:$8 sps:$4 sm:$0xff]   ;;  %v4173_v22 = vld [vmem:[%s5780_s1 + $0x8f4] ss:$8 sps:$4 sm:$0xff]  }
  0xed   :  { %2738 = vmatprep.subr.bf16.mxu1 %v4098_v23  ;;  %v4176_v23 = vld [vmem:[%s5780_s1 + $0x9f4] ss:$8 sps:$4 sm:$0xff]  }
  0xef   :  { %2696 = vmatpush2.bf16.msra.mxu0 %v4093_v24  ;;  %v4171_v24 = vld [vmem:[%s5780_s1 + $0x8f0] ss:$8 sps:$4 sm:$0xff]  }
  0xf0   :  { %2739 = vmatpush2.bf16.msra.mxu1 %v4096_v25  ;;  %2697 = vmatprep.subr.bf16.mxu0 %v4101_v26  ;;  %v4174_v25 = vld [vmem:[%s5780_s1 + $0x9f0] ss:$8 sps:$4 sm:$0xff]   ;;  %v4179_v26 = vld [vmem:[%s5780_s1 + $0x8e4] ss:$8 sps:$4 sm:$0xff]  }
  0xf1   :  { %2740 = vmatprep.subr.bf16.mxu1 %v4104_v27  ;;  %v4182_v27 = vld [vmem:[%s5780_s1 + $0x9e4] ss:$8 sps:$4 sm:$0xff]  }
  0xf3   :  { %2698 = vmatpush2.bf16.msra.mxu0 %v4099_v28  ;;  %v4177_v28 = vld [vmem:[%s5780_s1 + $0x8e0] ss:$8 sps:$4 sm:$0xff]  }
  0xf4   :  { %2741 = vmatpush2.bf16.msra.mxu1 %v4102_v29  ;;  %2699 = vmatprep.subr.bf16.mxu0 %v4107_v30  ;;  %v4180_v29 = vld [vmem:[%s5780_s1 + $0x9e0] ss:$8 sps:$4 sm:$0xff]   ;;  %v4185_v30 = vld [vmem:[%s5780_s1 + $0x8d4] ss:$8 sps:$4 sm:$0xff]  }
  0xf5   :  { %2742 = vmatprep.subr.bf16.mxu1 %v4110_v31  ;;  %v4188_v31 = vld [vmem:[%s5780_s1 + $0x9d4] ss:$8 sps:$4 sm:$0xff]  }
  0xf7   :  { %2700 = vmatpush2.bf16.msra.mxu0 %v4105_v32  ;;  %v4183_v32 = vld [vmem:[%s5780_s1 + $0x8d0] ss:$8 sps:$4 sm:$0xff]  }
  0xf8   :  { %2743 = vmatpush2.bf16.msra.mxu1 %v4108_v33  ;;  %2701 = vmatprep.subr.bf16.mxu0 %v4113_v34  ;;  %v4186_v33 = vld [vmem:[%s5780_s1 + $0x9d0] ss:$8 sps:$4 sm:$0xff]   ;;  %v4191_v34 = vld [vmem:[%s5780_s1 + $0x8c4] ss:$8 sps:$4 sm:$0xff]  }
  0xf9   :  { %2744 = vmatprep.subr.bf16.mxu1 %v4116_v35  ;;  %v4194_v35 = vld [vmem:[%s5780_s1 + $0x9c4] ss:$8 sps:$4 sm:$0xff]  }
  0xfb   :  { %2702 = vmatpush2.bf16.msra.mxu0 %v4111_v36  ;;  %v4189_v36 = vld [vmem:[%s5780_s1 + $0x8c0] ss:$8 sps:$4 sm:$0xff]  }
  0xfc   :  { %2745 = vmatpush2.bf16.msra.mxu1 %v4114_v37  ;;  %2703 = vmatprep.subr.bf16.mxu0 %v4119_v38  ;;  %v4192_v37 = vld [vmem:[%s5780_s1 + $0x9c0] ss:$8 sps:$4 sm:$0xff]   ;;  %v4197_v38 = vld [vmem:[%s5780_s1 + $0x8b4] ss:$8 sps:$4 sm:$0xff]  }
  0xfd   :  { %2746 = vmatprep.subr.bf16.mxu1 %v4122_v39  ;;  %v4200_v39 = vld [vmem:[%s5780_s1 + $0x9b4] ss:$8 sps:$4 sm:$0xff]  }
  0xff   :  { %2704 = vmatpush2.bf16.msra.mxu0 %v4117_v40  ;;  %v4195_v40 = vld [vmem:[%s5780_s1 + $0x8b0] ss:$8 sps:$4 sm:$0xff]  }
 0x100   :  { %2747 = vmatpush2.bf16.msra.mxu1 %v4120_v41  ;;  %2759 = vmatprep.subr.bf16.mxu0 %v4125_v46  ;;  %v4198_v41 = vld [vmem:[%s5780_s1 + $0x9b0] ss:$8 sps:$4 sm:$0xff]   ;;  %v4209_v46 = vld [vmem:[%s5780_s1 + $0x894] ss:$8 sps:$4 sm:$0xff]  }
 0x101   :  { %2802 = vmatprep.subr.bf16.mxu1 %v4128_v47  ;;  %v4212_v47 = vld [vmem:[%s5780_s1 + $0x994] ss:$8 sps:$4 sm:$0xff]  }
 0x102   :  { %2706 = vmatmul.mubr.bf16.vlgmr.msra.gmra.mxu0 %v87_v52  ;;  %v4213_v52 = vld [vmem:[%s5780_s1 + $0x880] ss:$8 sps:$4 sm:$0xff]  }
 0x103   :  { %2749 = vmatmul.mubr.bf16.vlgmr.msra.gmra.mxu1 %v89_v53  ;;  %2760 = vmatpush1.bf16.msra.mxu0 %v4123_v49  ;;  %v4210_v49 = vld [vmem:[%s5780_s1 + $0x990] ss:$8 sps:$4 sm:$0xff]   ;;  %v4216_v53 = vld [vmem:[%s5780_s1 + $0x980] ss:$8 sps:$4 sm:$0xff]  }
 0x104   :  { %2803 = vmatpush1.bf16.msra.mxu1 %v4126_v55  ;;  %2761 = vmatprep.subr.bf16.mxu0 %v4131_v56  ;;  %v67_v55 = vld [vmem:[%s5781_s0 + $0x140] sm:$0xff]  ;;  %v45_v56 = vld [vmem:[%s5781_s0 + $0x90] sm:$0xff] }
 0x105   :  { %2804 = vmatprep.subr.bf16.mxu1 %v4134_v57  ;;  %2791 = vmatprep.mubr.bf16.mxu0 %v92_v58  ;;  %v69_v57 = vld [vmem:[%s5781_s0 + $0x150] sm:$0xff] }
 0x106   :  { %2834 = vmatprep.mubr.bf16.mxu1 %v94_v59  ;;  %v4221_v58 = vld [vmem:[%s5780_s1 + $0xa74] ss:$8 sps:$4 sm:$0xff]  }
 0x107   :  { %2762 = vmatpush1.bf16.msra.mxu0 %v4129_v60  ;;  %v4224_v59 = vld [vmem:[%s5780_s1 + $0xb74] ss:$8 sps:$4 sm:$0xff]   ;;  %v48_v60 = vld [vmem:[%s5781_s0 + $0xa8] sm:$0xff] }
 0x108   :  { %2805 = vmatpush1.bf16.msra.mxu1 %v4132_v61  ;;  %2763 = vmatprep.subr.bf16.mxu0 %v4137_v62  ;;  %v91_v61 = vpack.c.bf16 %v67_v55, %v43_v54  ;;  %v93_v62 = vpack.c.bf16 %v69_v57, %v45_v56  ;;  %v4299_v54 = vld [vmem:[%s5780_s1 + $0xaa4] ss:$8 sps:$4 sm:$0xff]   ;;  %v4297_v56 = vld [vmem:[%s5780_s1 + $0xaa0] ss:$8 sps:$4 sm:$0xff]  }
 0x109   :  { %2806 = vmatprep.subr.bf16.mxu1 %v4140_v63  ;;  %v72_v63 = vld [vmem:[%s5781_s0 + $0x168] sm:$0xff] }
 0x10a   :  { %v4302_v55 = vld [vmem:[%s5780_s1 + $0xba4] ss:$8 sps:$4 sm:$0xff]   ;;  %v4300_v57 = vld [vmem:[%s5780_s1 + $0xba0] ss:$8 sps:$4 sm:$0xff]  }
 0x10b   :  { %2764 = vmatpush1.bf16.msra.mxu0 %v4135_v0  ;;  %v50_v0 = vld [vmem:[%s5781_s0 + $0xb8] sm:$0xff] }
 0x10c   :  { %2807 = vmatpush1.bf16.msra.mxu1 %v4138_v1  ;;  %2765 = vmatprep.subr.bf16.mxu0 %v4143_v2  ;;  %v74_v1 = vld [vmem:[%s5781_s0 + $0x178] sm:$0xff] }
 0x10d   :  { %2808 = vmatprep.subr.bf16.mxu1 %v4146_v3  ;;  %v4219_v2 = vld [vmem:[%s5780_s1 + $0xa70] ss:$8 sps:$4 sm:$0xff]  }
 0x10e   :  { %v4222_v3 = vld [vmem:[%s5780_s1 + $0xb70] ss:$8 sps:$4 sm:$0xff]  }
 0x10f   :  { %2766 = vmatpush1.bf16.msra.mxu0 %v4141_v4  ;;  %v4227_v4 = vld [vmem:[%s5780_s1 + $0xa64] ss:$8 sps:$4 sm:$0xff]  }
 0x110   :  { %2809 = vmatpush1.bf16.msra.mxu1 %v4144_v5  ;;  %2767 = vmatprep.subr.bf16.mxu0 %v4149_v6  ;;  %v4230_v5 = vld [vmem:[%s5780_s1 + $0xb64] ss:$8 sps:$4 sm:$0xff]   ;;  %v96_v6 = vpack.c.bf16 %v72_v63, %v48_v60  ;;  %v4303_v60 = vld [vmem:[%s5780_s1 + $0xa90] ss:$8 sps:$4 sm:$0xff]  }
 0x111   :  { %2810 = vmatprep.subr.bf16.mxu1 %v4152_v7  ;;  %v98_v7 = vpack.c.bf16 %v74_v1, %v50_v0  ;;  %v4314_v63 = vld [vmem:[%s5780_s1 + $0xb84] ss:$8 sps:$4 sm:$0xff]   ;;  %v4309_v0 = vld [vmem:[%s5780_s1 + $0xa80] ss:$8 sps:$4 sm:$0xff]  }
 0x112   :  { %v4312_v1 = vld [vmem:[%s5780_s1 + $0xb80] ss:$8 sps:$4 sm:$0xff]  }
 0x113   :  { %2768 = vmatpush1.bf16.msra.mxu0 %v4147_v8  ;;  %v4225_v8 = vld [vmem:[%s5780_s1 + $0xa60] ss:$8 sps:$4 sm:$0xff]  }
 0x114   :  { %2811 = vmatpush1.bf16.msra.mxu1 %v4150_v9  ;;  %2769 = vmatprep.subr.bf16.mxu0 %v4155_v10  ;;  %v4228_v9 = vld [vmem:[%s5780_s1 + $0xb60] ss:$8 sps:$4 sm:$0xff]   ;;  %v4233_v10 = vld [vmem:[%s5780_s1 + $0xa54] ss:$8 sps:$4 sm:$0xff]  }
 0x115   :  { %2812 = vmatprep.subr.bf16.mxu1 %v4158_v11  ;;  %v4236_v11 = vld [vmem:[%s5780_s1 + $0xb54] ss:$8 sps:$4 sm:$0xff]  }
 0x117   :  { %2770 = vmatpush1.bf16.msra.mxu0 %v4153_v12  ;;  %v4231_v12 = vld [vmem:[%s5780_s1 + $0xa50] ss:$8 sps:$4 sm:$0xff]  }
 0x118   :  { %2813 = vmatpush1.bf16.msra.mxu1 %v4156_v13  ;;  %2771 = vmatprep.subr.bf16.mxu0 %v4161_v14  ;;  %v4234_v13 = vld [vmem:[%s5780_s1 + $0xb50] ss:$8 sps:$4 sm:$0xff]   ;;  %v4239_v14 = vld [vmem:[%s5780_s1 + $0xa44] ss:$8 sps:$4 sm:$0xff]  }
 0x119   :  { %2814 = vmatprep.subr.bf16.mxu1 %v4164_v15  ;;  %v4242_v15 = vld [vmem:[%s5780_s1 + $0xb44] ss:$8 sps:$4 sm:$0xff]  }
 0x11b   :  { %2772 = vmatpush1.bf16.msra.mxu0 %v4159_v16  ;;  %v4237_v16 = vld [vmem:[%s5780_s1 + $0xa40] ss:$8 sps:$4 sm:$0xff]  }
 0x11c   :  { %2815 = vmatpush1.bf16.msra.mxu1 %v4162_v17  ;;  %2773 = vmatprep.subr.bf16.mxu0 %v4167_v18  ;;  %v4240_v17 = vld [vmem:[%s5780_s1 + $0xb40] ss:$8 sps:$4 sm:$0xff]   ;;  %v4245_v18 = vld [vmem:[%s5780_s1 + $0xa34] ss:$8 sps:$4 sm:$0xff]  }
 0x11d   :  { %2816 = vmatprep.subr.bf16.mxu1 %v4170_v19  ;;  %v4248_v19 = vld [vmem:[%s5780_s1 + $0xb34] ss:$8 sps:$4 sm:$0xff]  }
 0x11f   :  { %2774 = vmatpush1.bf16.msra.mxu0 %v4165_v20  ;;  %v4243_v20 = vld [vmem:[%s5780_s1 + $0xa30] ss:$8 sps:$4 sm:$0xff]  }
 0x120   :  { %2817 = vmatpush1.bf16.msra.mxu1 %v4168_v21  ;;  %2775 = vmatprep.subr.bf16.mxu0 %v4173_v22  ;;  %v4246_v21 = vld [vmem:[%s5780_s1 + $0xb30] ss:$8 sps:$4 sm:$0xff]   ;;  %v4251_v22 = vld [vmem:[%s5780_s1 + $0xa24] ss:$8 sps:$4 sm:$0xff]  }
 0x121   :  { %2818 = vmatprep.subr.bf16.mxu1 %v4176_v23  ;;  %v4254_v23 = vld [vmem:[%s5780_s1 + $0xb24] ss:$8 sps:$4 sm:$0xff]  }
 0x123   :  { %2776 = vmatpush2.bf16.msra.mxu0 %v4171_v24  ;;  %v4249_v24 = vld [vmem:[%s5780_s1 + $0xa20] ss:$8 sps:$4 sm:$0xff]  }
 0x124   :  { %2819 = vmatpush2.bf16.msra.mxu1 %v4174_v25  ;;  %2777 = vmatprep.subr.bf16.mxu0 %v4179_v26  ;;  %v4252_v25 = vld [vmem:[%s5780_s1 + $0xb20] ss:$8 sps:$4 sm:$0xff]   ;;  %v4257_v26 = vld [vmem:[%s5780_s1 + $0xa14] ss:$8 sps:$4 sm:$0xff]  }
 0x125   :  { %2820 = vmatprep.subr.bf16.mxu1 %v4182_v27  ;;  %v4260_v27 = vld [vmem:[%s5780_s1 + $0xb14] ss:$8 sps:$4 sm:$0xff]  }
 0x127   :  { %2778 = vmatpush2.bf16.msra.mxu0 %v4177_v28  ;;  %v4255_v28 = vld [vmem:[%s5780_s1 + $0xa10] ss:$8 sps:$4 sm:$0xff]  }
 0x128   :  { %2821 = vmatpush2.bf16.msra.mxu1 %v4180_v29  ;;  %2779 = vmatprep.subr.bf16.mxu0 %v4185_v30  ;;  %v4258_v29 = vld [vmem:[%s5780_s1 + $0xb10] ss:$8 sps:$4 sm:$0xff]   ;;  %v4263_v30 = vld [vmem:[%s5780_s1 + $0xa04] ss:$8 sps:$4 sm:$0xff]  }
 0x129   :  { %2822 = vmatprep.subr.bf16.mxu1 %v4188_v31  ;;  %v4266_v31 = vld [vmem:[%s5780_s1 + $0xb04] ss:$8 sps:$4 sm:$0xff]  }
 0x12b   :  { %2780 = vmatpush2.bf16.msra.mxu0 %v4183_v32  ;;  %v4261_v32 = vld [vmem:[%s5780_s1 + $0xa00] ss:$8 sps:$4 sm:$0xff]  }
 0x12c   :  { %2823 = vmatpush2.bf16.msra.mxu1 %v4186_v33  ;;  %2781 = vmatprep.subr.bf16.mxu0 %v4191_v34  ;;  %v4264_v33 = vld [vmem:[%s5780_s1 + $0xb00] ss:$8 sps:$4 sm:$0xff]   ;;  %v4269_v34 = vld [vmem:[%s5780_s1 + $0xaf4] ss:$8 sps:$4 sm:$0xff]  }
 0x12d   :  { %2824 = vmatprep.subr.bf16.mxu1 %v4194_v35  ;;  %v4272_v35 = vld [vmem:[%s5780_s1 + $0xbf4] ss:$8 sps:$4 sm:$0xff]  }
 0x12f   :  { %2782 = vmatpush2.bf16.msra.mxu0 %v4189_v36  ;;  %v4267_v36 = vld [vmem:[%s5780_s1 + $0xaf0] ss:$8 sps:$4 sm:$0xff]  }
 0x130   :  { %2825 = vmatpush2.bf16.msra.mxu1 %v4192_v37  ;;  %2783 = vmatprep.subr.bf16.mxu0 %v4197_v38  ;;  %v4270_v37 = vld [vmem:[%s5780_s1 + $0xbf0] ss:$8 sps:$4 sm:$0xff]   ;;  %v4275_v38 = vld [vmem:[%s5780_s1 + $0xae4] ss:$8 sps:$4 sm:$0xff]  }
 0x131   :  { %2826 = vmatprep.subr.bf16.mxu1 %v4200_v39  ;;  %v4278_v39 = vld [vmem:[%s5780_s1 + $0xbe4] ss:$8 sps:$4 sm:$0xff]  }
 0x133   :  { %2784 = vmatpush2.bf16.msra.mxu0 %v4195_v40  ;;  %v4273_v40 = vld [vmem:[%s5780_s1 + $0xae0] ss:$8 sps:$4 sm:$0xff]  }
 0x134   :  { %2827 = vmatpush2.bf16.msra.mxu1 %v4198_v41  ;;  %2785 = vmatprep.subr.bf16.mxu0 %v4203_v42  ;;  %v4276_v41 = vld [vmem:[%s5780_s1 + $0xbe0] ss:$8 sps:$4 sm:$0xff]   ;;  %v4281_v42 = vld [vmem:[%s5780_s1 + $0xad4] ss:$8 sps:$4 sm:$0xff]  }
 0x135   :  { %2828 = vmatprep.subr.bf16.mxu1 %v4206_v43  ;;  %v4284_v43 = vld [vmem:[%s5780_s1 + $0xbd4] ss:$8 sps:$4 sm:$0xff]  }
 0x137   :  { %2786 = vmatpush2.bf16.msra.mxu0 %v4201_v44  ;;  %v4279_v44 = vld [vmem:[%s5780_s1 + $0xad0] ss:$8 sps:$4 sm:$0xff]  }
 0x138   :  { %2829 = vmatpush2.bf16.msra.mxu1 %v4204_v45  ;;  %2787 = vmatprep.subr.bf16.mxu0 %v4209_v46  ;;  %v4282_v45 = vld [vmem:[%s5780_s1 + $0xbd0] ss:$8 sps:$4 sm:$0xff]   ;;  %v4287_v46 = vld [vmem:[%s5780_s1 + $0xac4] ss:$8 sps:$4 sm:$0xff]  }
 0x139   :  { %2830 = vmatprep.subr.bf16.mxu1 %v4212_v47  ;;  %v4290_v47 = vld [vmem:[%s5780_s1 + $0xbc4] ss:$8 sps:$4 sm:$0xff]  }
 0x13b   :  { %2788 = vmatpush2.bf16.msra.mxu0 %v4207_v48  ;;  %v4285_v48 = vld [vmem:[%s5780_s1 + $0xac0] ss:$8 sps:$4 sm:$0xff]  }
 0x13c   :  { %2831 = vmatpush2.bf16.msra.mxu1 %v4210_v49  ;;  %2789 = vmatprep.subr.bf16.mxu0 %v4215_v50  ;;  %v4288_v49 = vld [vmem:[%s5780_s1 + $0xbc0] ss:$8 sps:$4 sm:$0xff]   ;;  %v4293_v50 = vld [vmem:[%s5780_s1 + $0xab4] ss:$8 sps:$4 sm:$0xff]  }
 0x13d   :  { %2832 = vmatprep.subr.bf16.mxu1 %v4218_v51  ;;  %v4296_v51 = vld [vmem:[%s5780_s1 + $0xbb4] ss:$8 sps:$4 sm:$0xff]  }
 0x13f   :  { %2790 = vmatpush2.bf16.msra.mxu0 %v4213_v52  ;;  %v4291_v52 = vld [vmem:[%s5780_s1 + $0xab0] ss:$8 sps:$4 sm:$0xff]  }
 0x140   :  { %2833 = vmatpush2.bf16.msra.mxu1 %v4216_v53  ;;  %2845 = vmatprep.subr.bf16.mxu0 %v4221_v58  ;;  %v4294_v53 = vld [vmem:[%s5780_s1 + $0xbb0] ss:$8 sps:$4 sm:$0xff]   ;;  %v4305_v58 = vld [vmem:[%s5780_s1 + $0xa94] ss:$8 sps:$4 sm:$0xff]  }
 0x141   :  { %2888 = vmatprep.subr.bf16.mxu1 %v4224_v59  ;;  %v4308_v59 = vld [vmem:[%s5780_s1 + $0xb94] ss:$8 sps:$4 sm:$0xff]  }
 0x142   :  { %2792 = vmatmul.mubr.bf16.vlgmr.msra.gmra.mxu0 %v91_v61  ;;  %v4306_v61 = vld [vmem:[%s5780_s1 + $0xb90] ss:$8 sps:$4 sm:$0xff]  }
 0x143   :  { %2835 = vmatmul.mubr.bf16.vlgmr.msra.gmra.mxu1 %v93_v62  ;;  %2846 = vmatpush1.bf16.msra.mxu0 %v4219_v2  ;;  %v4311_v62 = vld [vmem:[%s5780_s1 + $0xa84] ss:$8 sps:$4 sm:$0xff]  }
 0x144   :  { %2889 = vmatpush1.bf16.msra.mxu1 %v4222_v3  ;;  %2847 = vmatprep.subr.bf16.mxu0 %v4227_v4  ;;  %v47_v2 = vld [vmem:[%s5781_s0 + $0xa0] sm:$0xff]  ;;  %v49_v4 = vld [vmem:[%s5781_s0 + $0xb0] sm:$0xff] }
 0x145   :  { %2890 = vmatprep.subr.bf16.mxu1 %v4230_v5  ;;  %2877 = vmatprep.mubr.bf16.mxu0 %v96_v6  ;;  %v71_v3 = vld [vmem:[%s5781_s0 + $0x160] sm:$0xff]  ;;  %v73_v5 = vld [vmem:[%s5781_s0 + $0x170] sm:$0xff] }
 0x146   :  { %2920 = vmatprep.mubr.bf16.mxu1 %v98_v7  ;;  %v95_v6 = vpack.c.bf16 %v71_v3, %v47_v2  ;;  %v97_v7 = vpack.c.bf16 %v73_v5, %v49_v4 }
 0x147   :  { %2848 = vmatpush1.bf16.msra.mxu0 %v4225_v8  ;;  %v4315_v8 = vld [vmem:[%s5782_s3 + $0x78] sm:$0xff]  }
 0x148   :  { %2891 = vmatpush1.bf16.msra.mxu1 %v4228_v9  ;;  %2849 = vmatprep.subr.bf16.mxu0 %v4233_v10  ;;  %v4316_v9 = vld [vmem:[%s5782_s3 + $0x38] sm:$0xff]   ;;  %v4317_v10 = vld [vmem:[%s5782_s3 + $0x70] sm:$0xff]  }
 0x149   :  { %2892 = vmatprep.subr.bf16.mxu1 %v4236_v11  ;;  %v4318_v11 = vld [vmem:[%s5782_s3 + $0x30] sm:$0xff]  }
 0x14b   :  { %2850 = vmatpush1.bf16.msra.mxu0 %v4231_v12  ;;  %v4319_v12 = vld [vmem:[%s5782_s3 + $0x68] sm:$0xff]  }
 0x14c   :  { %2893 = vmatpush1.bf16.msra.mxu1 %v4234_v13  ;;  %2851 = vmatprep.subr.bf16.mxu0 %v4239_v14  ;;  %v4320_v13 = vld [vmem:[%s5782_s3 + $0x28] sm:$0xff]   ;;  %v4321_v14 = vld [vmem:[%s5782_s3 + $0x60] sm:$0xff]  }
 0x14d   :  { %2894 = vmatprep.subr.bf16.mxu1 %v4242_v15  ;;  %v4322_v15 = vld [vmem:[%s5782_s3 + $0x20] sm:$0xff]  }
 0x14f   :  { %2852 = vmatpush1.bf16.msra.mxu0 %v4237_v16  ;;  %v4323_v16 = vld [vmem:[%s5782_s3 + $0x58] sm:$0xff]  }
 0x150   :  { %2895 = vmatpush1.bf16.msra.mxu1 %v4240_v17  ;;  %2853 = vmatprep.subr.bf16.mxu0 %v4245_v18  ;;  %v4324_v17 = vld [vmem:[%s5782_s3 + $0x18] sm:$0xff]   ;;  %v4325_v18 = vld [vmem:[%s5782_s3 + $0x50] sm:$0xff]  }
 0x151   :  { %2896 = vmatprep.subr.bf16.mxu1 %v4248_v19  ;;  %v4326_v19 = vld [vmem:[%s5782_s3 + $0x10] sm:$0xff]  }
 0x153   :  { %2854 = vmatpush1.bf16.msra.mxu0 %v4243_v20  ;;  %v4327_v20 = vld [vmem:[%s5782_s3 + $0x48] sm:$0xff]  }
 0x154   :  { %2897 = vmatpush1.bf16.msra.mxu1 %v4246_v21  ;;  %2855 = vmatprep.subr.bf16.mxu0 %v4251_v22  ;;  %v4328_v21 = vld [vmem:[%s5782_s3 + $0x8] sm:$0xff]   ;;  %v4329_v22 = vld [vmem:[%s5782_s3 + $0x40] sm:$0xff]  }
 0x155   :  { %2898 = vmatprep.subr.bf16.mxu1 %v4254_v23  ;;  %v4330_v23 = vld [vmem:[%s5782_s3] sm:$0xff]  }
 0x157   :  { %2856 = vmatpush1.bf16.msra.mxu0 %v4249_v24  ;;  %v4347_v24 = vmov 0.0  }
 0x158   :  { %2899 = vmatpush1.bf16.msra.mxu1 %v4252_v25  ;;  %2857 = vmatprep.subr.bf16.mxu0 %v4257_v26  ;;  %v4331_v25 = vld [vmem:[%s5783_s5 + $0x38] sm:$0xff]   ;;  %v4332_v26 = vld [vmem:[%s5783_s5 + $0x30] sm:$0xff]  }
 0x159   :  { %2900 = vmatprep.subr.bf16.mxu1 %v4260_v27  ;;  %v4333_v27 = vld [vmem:[%s5783_s5 + $0x28] sm:$0xff]  }
 0x15b   :  { %2858 = vmatpush1.bf16.msra.mxu0 %v4255_v28  ;;  %v4334_v28 = vld [vmem:[%s5783_s5 + $0x20] sm:$0xff]  }
 0x15c   :  { %2901 = vmatpush1.bf16.msra.mxu1 %v4258_v29  ;;  %2859 = vmatprep.subr.bf16.mxu0 %v4263_v30  ;;  %v2449_v29 = vpop.f32.mrf.mxu0  ;;  %v2492_v30 = vpop.f32.mrf.mxu1 }
 0x15d   :  { %2902 = vmatprep.subr.bf16.mxu1 %v4266_v31 }
 0x15e   :  { %v2451_v31 = vpop.f32.mrf.mxu0 }
 0x15f   :  { %2860 = vmatpush1.bf16.msra.mxu0 %v4261_v32  ;;  %v2494_v32 = vpop.f32.mrf.mxu1 }
 0x160   :  { %2903 = vmatpush1.bf16.msra.mxu1 %v4264_v33  ;;  %2861 = vmatprep.subr.bf16.mxu0 %v4269_v34  ;;  %v2453_v33 = vpop.f32.mrf.mxu0 }
 0x161   :  { %2904 = vmatprep.subr.bf16.mxu1 %v4272_v35  ;;  %v2496_v34 = vpop.f32.mrf.mxu1 }
 0x162   :  { %v2455_v35 = vpop.f32.mrf.mxu0 }
 0x163   :  { %2862 = vmatpush2.bf16.msra.mxu0 %v4267_v36  ;;  %v2498_v36 = vpop.f32.mrf.mxu1 }
 0x164   :  { %2905 = vmatpush2.bf16.msra.mxu1 %v4270_v37  ;;  %2863 = vmatprep.subr.bf16.mxu0 %v4275_v38  ;;  %v2535_v37 = vpop.f32.mrf.mxu0 }
 0x165   :  { %2906 = vmatprep.subr.bf16.mxu1 %v4278_v39  ;;  %v2578_v38 = vpop.f32.mrf.mxu1 }
 0x166   :  { %v2537_v39 = vpop.f32.mrf.mxu0 }
 0x167   :  { %2864 = vmatpush2.bf16.msra.mxu0 %v4273_v40  ;;  %v2580_v40 = vpop.f32.mrf.mxu1 }
 0x168   :  { %2907 = vmatpush2.bf16.msra.mxu1 %v4276_v41  ;;  %2865 = vmatprep.subr.bf16.mxu0 %v4281_v42  ;;  %v2539_v41 = vpop.f32.mrf.mxu0 }
 0x169   :  { %2908 = vmatprep.subr.bf16.mxu1 %v4284_v43  ;;  %v2582_v42 = vpop.f32.mrf.mxu1 }
 0x16a   :  { %v2541_v43 = vpop.f32.mrf.mxu0 }
 0x16b   :  { %2866 = vmatpush2.bf16.msra.mxu0 %v4279_v44  ;;  %v2584_v44 = vpop.f32.mrf.mxu1 }
 0x16c   :  { %2909 = vmatpush2.bf16.msra.mxu1 %v4282_v45  ;;  %2867 = vmatprep.subr.bf16.mxu0 %v4287_v46  ;;  %v485_v45 = vlaneseq }
 0x16d   :  { %2910 = vmatprep.subr.bf16.mxu1 %v4290_v47 }
 0x16f   :  { %2868 = vmatpush2.bf16.msra.mxu0 %v4285_v48  ;;  %v486_v48 = vshrl.u32 %v485_v45, 7 }
 0x170   :  { %2911 = vmatpush2.bf16.msra.mxu1 %v4288_v49  ;;  %2869 = vmatprep.subr.bf16.mxu0 %v4293_v50 }
 0x171   :  { %2912 = vmatprep.subr.bf16.mxu1 %v4296_v51  ;;  %v491_v51 = vsub.s32 1, %v486_v48 }
 0x173   :  { %2870 = vmatpush2.bf16.msra.mxu0 %v4291_v52  ;;  %v483_v52 = vld [vmem:[%s5784_s2] sm:$0x3] }
 0x174   :  { %2913 = vmatpush2.bf16.msra.mxu1 %v4294_v53  ;;  %2871 = vmatprep.subr.bf16.mxu0 %v4299_v54  ;;  %v487_v53 = vsub.s32 0, %v486_v48 }
 0x175   :  { %2914 = vmatprep.subr.bf16.mxu1 %v4302_v55 }
 0x177   :  { %2872 = vmatpush2.bf16.msra.mxu0 %v4297_v56  ;;  %v492_v56 = vrot.slane %v483_v52, %v491_v51 }
 0x178   :  { %2915 = vmatpush2.bf16.msra.mxu1 %v4300_v57  ;;  %2873 = vmatprep.subr.bf16.mxu0 %v4305_v58  ;;  %v488_v57 = vrot.slane %v483_v52, %v487_v53 }
 0x179   :  { %2916 = vmatprep.subr.bf16.mxu1 %v4308_v59  ;;  %v2456_v4 = vadd.f32 %v2455_v35, %v492_v56 }
 0x17b   :  { %2874 = vmatpush2.bf16.msra.mxu0 %v4303_v60 }
 0x17c   :  { %2917 = vmatpush2.bf16.msra.mxu1 %v4306_v61  ;;  %2875 = vmatprep.subr.bf16.mxu0 %v4311_v62  ;;  %v2452_v62 = vadd.f32 %v2451_v31, %v492_v56 }
 0x17d   :  { %2918 = vmatprep.subr.bf16.mxu1 %v4314_v63  ;;  %v2450_v63 = vadd.f32 %v2449_v29, %v488_v57 }
 0x17e   :  { %v2495_v3 = vadd.f32 %v2494_v32, %v2452_v62 }
 0x17f   :  { %2876 = vmatpush2.bf16.msra.mxu0 %v4309_v0  ;;  %v2454_v0 = vadd.f32 %v2453_v33, %v488_v57  ;;  %v2493_v5 = vadd.f32 %v2492_v30, %v2450_v63 }
 0x180   :  { %2919 = vmatpush2.bf16.msra.mxu1 %v4312_v1  ;;  %3686 = vmatprep.subr.bf16.mxu0 %v4315_v8 }
 0x181   :  { %3717 = vmatprep.subr.bf16.mxu1 %v4347_v24  ;;  %v2536_v8 = vadd.f32 %v2535_v37, %v2493_v5 }
 0x182   :  { %2878 = vmatmul.mubr.bf16.vlgmr.msra.gmra.mxu0 %v95_v6  ;;  %v2621_v46 = vpop.f32.mrf.mxu0  ;;  %v2497_v6 = vadd.f32 %v2496_v34, %v2454_v0 }
 0x183   :  { %2921 = vmatmul.mubr.bf16.vlgmr.msra.gmra.mxu1 %v97_v7  ;;  %3687 = vmatpush3.bf16.msra.mxu0 %v4316_v9  ;;  %v2664_v47 = vpop.f32.mrf.mxu1  ;;  %v2538_v7 = vadd.f32 %v2537_v39, %v2495_v3 }
 0x184   :  { %3688 = vmatprep.subr.bf16.mxu0 %v4317_v10  ;;  %3718 = vmatpush3.bf16.msra.mxu1 %v4331_v25  ;;  %v2623_v49 = vpop.f32.mrf.mxu0 }
 0x185   :  { %3719 = vmatprep.subr.bf16.mxu1 %v4347_v24  ;;  %v2666_v50 = vpop.f32.mrf.mxu1  ;;  %3733 = vmatprep.mubr.msk.bf16.mxu1 %vm4348_vm0, %v4347_v24 }
 0x186   :  { %v2625_v54 = vpop.f32.mrf.mxu0 }
 0x187   :  { %3689 = vmatpush3.bf16.msra.mxu0 %v4318_v11  ;;  %v2668_v55 = vpop.f32.mrf.mxu1  ;;  %v2499_v11 = vadd.f32 %v2498_v36, %v2456_v4 }
 0x188   :  { %3690 = vmatprep.subr.bf16.mxu0 %v4319_v12  ;;  %3720 = vmatpush3.bf16.msra.mxu1 %v4332_v26  ;;  %v2627_v58 = vpop.f32.mrf.mxu0  ;;  %v2540_v12 = vadd.f32 %v2539_v41, %v2497_v6 }
 0x189   :  { %3721 = vmatprep.subr.bf16.mxu1 %v4347_v24  ;;  %v2670_v59 = vpop.f32.mrf.mxu1 }
 0x18b   :  { %3691 = vmatpush3.bf16.msra.mxu0 %v4320_v13  ;;  %v2581_v13 = vadd.f32 %v2580_v40, %v2538_v7 }
 0x18c   :  { %3692 = vmatprep.subr.bf16.mxu0 %v4321_v14  ;;  %3722 = vmatpush3.bf16.msra.mxu1 %v4333_v27  ;;  %v2542_v14 = vadd.f32 %v2541_v43, %v2499_v11 }
 0x18d   :  { %3723 = vmatprep.subr.bf16.mxu1 %v4347_v24 }
 0x18f   :  { %3693 = vmatpush3.bf16.msra.mxu0 %v4322_v15  ;;  %v2579_v15 = vadd.f32 %v2578_v38, %v2536_v8 }
 0x190   :  { %3694 = vmatprep.subr.bf16.mxu0 %v4323_v16  ;;  %3724 = vmatpush3.bf16.msra.mxu1 %v4334_v28 }
 0x191   :  { %3725 = vmatprep.subr.bf16.mxu1 %v4347_v24 }
 0x193   :  { %3695 = vmatpush3.bf16.msra.mxu0 %v4324_v17 }
 0x194   :  { %3696 = vmatprep.subr.bf16.mxu0 %v4325_v18  ;;  %v2583_v18 = vadd.f32 %v2582_v42, %v2540_v12  ;;  %v4335_v12 = vld [vmem:[%s5783_s5 + $0x18] sm:$0xff]  }
 0x195   :  { %3726 = vmatpush3.bf16.msra.mxu1 %v4335_v12 }
 0x196   :  { %v2626_v25 = vadd.f32 %v2625_v54, %v2583_v18  ;;  %3727 = vmatprep.subr.bf16.mxu1 %v4347_v24 }
 0x197   :  { %3697 = vmatpush3.bf16.msra.mxu0 %v4326_v19  ;;  %v2624_v19 = vadd.f32 %v2623_v49, %v2581_v13  ;;  %v4336_v13 = vld [vmem:[%s5783_s5 + $0x10] sm:$0xff]  }
 0x198   :  { %3698 = vmatprep.subr.bf16.mxu0 %v4327_v20  ;;  %v2622_v20 = vadd.f32 %v2621_v46, %v2579_v15  ;;  %v2669_v31 = vadd.f32 %v2668_v55, %v2626_v25  ;;  %v4338_v15 = vld [vmem:[%s5783_s5] sm:$0xff]  }
 0x199   :  { %v2667_v26 = vadd.f32 %v2666_v50, %v2624_v19  ;;  %3728 = vmatpush3.bf16.msra.mxu1 %v4336_v13  ;;  %v3651_v19 = vld [vmem:[%s5785_s4] ss:$0 sm:$0xff] }
 0x19a   :  { %v2665_v28 = vadd.f32 %v2664_v47, %v2622_v20  ;;  %3729 = vmatprep.subr.bf16.mxu1 %v4347_v24 }
 0x19b   :  { %3699 = vmatpush3.bf16.msra.mxu0 %v4328_v21 }
 0x19c   :  { %3700 = vmatprep.subr.bf16.mxu0 %v4329_v22 }
 0x19f   :  { %3701 = vmatpush3.bf16.msra.mxu0 %v4330_v23  ;;  %v2585_v23 = vadd.f32 %v2584_v44, %v2542_v14  ;;  %v4337_v14 = vld [vmem:[%s5783_s5 + $0x8] sm:$0xff]  }
 0x1a0   :  { %3730 = vmatpush3.bf16.msra.mxu1 %v4337_v14 }
 0x1a1   :  { %v2628_v27 = vadd.f32 %v2627_v58, %v2585_v23  ;;  %3731 = vmatprep.subr.bf16.mxu1 %v4347_v24  ;;  %v3668_v24 = vld [vmem:[%s5786_s6] ss:$0 sm:$0xff] }
 0x1a3   :  { %v2671_v34 = vadd.f32 %v2670_v59, %v2628_v27 }
 0x1a4   :  { %3732 = vmatpush3.bf16.msra.mxu1 %v4338_v15 }
 0x1c2   :  { %v2707_v60 = vpop.f32.mrf.mxu0 }
 0x1c3   :  { %v2750_v61 = vpop.f32.mrf.mxu1  ;;  %v2708_v33 = vadd.f32 %v2707_v60, %v2665_v28 }
 0x1c4   :  { %v2709_v1 = vpop.f32.mrf.mxu0 }
 0x1c5   :  { %v2752_v2 = vpop.f32.mrf.mxu1  ;;  %v2710_v32 = vadd.f32 %v2709_v1, %v2667_v26  ;;  %v2751_v40 = vadd.f32 %v2750_v61, %v2708_v33 }
 0x1c6   :  { %v2711_v9 = vpop.f32.mrf.mxu0 }
 0x1c7   :  { %v2754_v10 = vpop.f32.mrf.mxu1  ;;  %v2712_v35 = vadd.f32 %v2711_v9, %v2669_v31  ;;  %v2753_v38 = vadd.f32 %v2752_v2, %v2710_v32 }
 0x1c8   :  { %v2713_v16 = vpop.f32.mrf.mxu0 }
 0x1c9   :  { %v2756_v17 = vpop.f32.mrf.mxu1  ;;  %v2714_v39 = vadd.f32 %v2713_v16, %v2671_v34  ;;  %v2755_v41 = vadd.f32 %v2754_v10, %v2712_v35 }
 0x1cb   :  { %v2757_v48 = vadd.f32 %v2756_v17, %v2714_v39 }
 0x202   :  { %v2793_v21 = vpop.f32.mrf.mxu0 }
 0x203   :  { %v2836_v22 = vpop.f32.mrf.mxu1  ;;  %v2794_v43 = vadd.f32 %v2793_v21, %v2751_v40 }
 0x204   :  { %v2795_v29 = vpop.f32.mrf.mxu0 }
 0x205   :  { %v2838_v30 = vpop.f32.mrf.mxu1  ;;  %v2796_v42 = vadd.f32 %v2795_v29, %v2753_v38  ;;  %v2837_v53 = vadd.f32 %v2836_v22, %v2794_v43  ;;  %v3229_v29 = vand.u32 127, %v485_v45 }
 0x206   :  { %v2797_v36 = vpop.f32.mrf.mxu0 }
 0x207   :  { %v2840_v37 = vpop.f32.mrf.mxu1  ;;  %v2798_v49 = vadd.f32 %v2797_v36, %v2755_v41  ;;  %v2839_v51 = vadd.f32 %v2838_v30, %v2796_v42  ;;  %vm3230_vm1 = vcmp.lt.s32.totalorder %v3229_v29, 10 }
 0x208   :  { %v2799_v44 = vpop.f32.mrf.mxu0 }
 0x209   :  { %v2842_v46 = vpop.f32.mrf.mxu1  ;;  %v2800_v52 = vadd.f32 %v2799_v44, %v2757_v48  ;;  %v2841_v56 = vadd.f32 %v2840_v37, %v2798_v49 }
 0x20b   :  { %v2843_v61 = vadd.f32 %v2842_v46, %v2800_v52 }
 0x242   :  { %v2879_v47 = vpop.f32.mrf.mxu0 }
 0x243   :  { %v2922_v50 = vpop.f32.mrf.mxu1  ;;  %v2880_v58 = vadd.f32 %v2879_v47, %v2837_v53 }
 0x244   :  { %v2881_v54 = vpop.f32.mrf.mxu0 }
 0x245   :  { %v2924_v55 = vpop.f32.mrf.mxu1  ;;  %v2882_v57 = vadd.f32 %v2881_v54, %v2839_v51  ;;  %v2923_v3 = vadd.f32 %v2922_v50, %v2880_v58 }
 0x246   :  { %v2883_v59 = vpop.f32.mrf.mxu0 }
 0x247   :  { %v2926_v60 = vpop.f32.mrf.mxu1  ;;  %v2884_v62 = vadd.f32 %v2883_v59, %v2841_v56  ;;  %v2925_v0 = vadd.f32 %v2924_v55, %v2882_v57  ;;  %v2931_v9 = vmax.f32 %v2923_v3, 0.0 }
 0x248   :  { %v2885_v63 = vpop.f32.mrf.mxu0 }
 0x249   :  { %v2927_v1 = vadd.f32 %v2926_v60, %v2884_v62  ;;  %v2886_v2 = vadd.f32 %v2885_v63, %v2843_v61  ;;  %v2928_v4 = vpop.f32.mrf.mxu1  ;;  %v2932_v7 = vmax.f32 %v2925_v0, 0.0 }
 0x24b   :  { %v2929_v5 = vadd.f32 %v2928_v4, %v2886_v2  ;;  %v2933_v6 = vmax.f32 %v2927_v1, 0.0 }
 0x24d   :  { %v2934_v8 = vmax.f32 %v2929_v5, 0.0  ;;  %v2935_v11 = vpack.c.bf16 %v2933_v6, %v2931_v9 }
 0x24f   :  { %v2936_v10 = vpack.c.bf16 %v2934_v8, %v2932_v7 }
 0x251   :  { %3104 = vmatprep.mubr.bf16.mxu0 %v2936_v10 }
 0x252   :  { %3105 = vmatmul.mubr.bf16.vlgmr.msra.gmra.mxu0 %v2935_v11 }
 0x312   :  { %v3702_v16 = vpop.f32.mrf.mxu0 }
 0x314   :  { %v3703_v17 = vpop.f32.mrf.mxu0 }
 0x315   :  { %v3704_v18 = vadd.f32 %v3703_v17, %v3702_v16 }
 0x316   :  { %v3705_v20 = vpop.f32.mrf.mxu0 }
 0x317   :  { %v3107_v22 = vadd.f32 %v3704_v18, %v3651_v19 }
 0x318   :  { %v3706_v21 = vpop.f32.mrf.mxu0 }
 0x319   :  { %v3707_v23 = vadd.f32 %v3706_v21, %v3705_v20  ;;  %v3113_v26 = vmax.f32 %v3107_v22, 0.0 }
 0x31b   :  { %v3110_v25 = vadd.f32 %v3707_v23, %v3651_v19 }
 0x31d   :  { %v3114_v27 = vmax.f32 %v3110_v25, 0.0 }
 0x31f   :  { %v3115_v28 = vpack.c.bf16 %v3114_v27, %v3113_v26 }
 0x321   :  { %3734 = vmatmul.mubr.bf16.vlgmr.msra.gmra.mxu1 %v3115_v28 }
 0x3e1   :  { %v3221_v30 = vpop.f32.mrf.mxu1 }
 0x3e2   :  { %v3222_v31 = vadd.f32 %v3668_v24, %v3221_v30 }
 0x3e3   :  { %v3735_v32 = vpop.f32.mrf.mxu1 }
 0x3e4   :  { %v3231_v33 = vsel %vm3230_vm1, %v3222_v31, -inf }
 0x3e5   :  { %3233 = vmax.xlane.f32.xlu0 %v3231_v33  ;;  %v3224_v34 = vpop.f32.mrf.mxu1 }
 0x3e6   :  { %v3225_v35 = vadd.f32 %v3668_v24, %v3224_v34 }
 0x3e7   :  { %v3736_v36 = vpop.f32.mrf.mxu1 }
 0x3e8   :  { %v3232_v37 = vsel %vm3230_vm1, %v3225_v35, -inf }
 0x3e9   :  { %3235 = vmax.xlane.f32.xlu0 %v3232_v37 }
 0x46e   :  { %v3234_v38 = vpop.xlane.xlu0 %3233 }
 0x46f   :  { %v3237_v39 = vsub.f32 %v3231_v33, %v3234_v38 }
 0x471   :  { %v3239_v40 = vmul.f32 1.442695, %v3237_v39 }
 0x472   :  { %v3236_v41 = vpop.xlane.xlu0 %3235 }
 0x473   :  { %v3238_v45 = vsub.f32 %v3232_v37, %v3236_v41  ;;  %4339 = vpow2.f32 %v3239_v40 }
 0x475   :  { %v3241_v42 = vmul.f32 1.442695, %v3238_v45 }
 0x477   :  { %4341 = vpow2.f32 %v3241_v42 }
 0x480   :  { %v4340_v43 = vpop.eup %4339 }
 0x481   :  { %3243 = vadd.xlane.f32.xlu1 %v4340_v43 }
 0x484   :  { %v4342_v44 = vpop.eup %4341 }
 0x485   :  { %3245 = vadd.xlane.f32.xlu1 %v4342_v44 }
 0x50a   :  { %v3244_v46 = vpop.xlane.xlu1 %3243 }
 0x50b   :  { %4343 = vlog2.f32 %v3244_v46 }
 0x50e   :  { %v3246_v48 = vpop.xlane.xlu1 %3245 }
 0x50f   :  { %4345 = vlog2.f32 %v3246_v48 }
 0x518   :  { %v4344_v49 = vpop.eup %4343 }
 0x519   :  { %v3248_v47 = vmul.f32 0.6931472, %v4344_v49 }
 0x51b   :  { %v3251_v52 = vsub.f32 %v3237_v39, %v3248_v47 }
 0x51c   :  { %v4346_v50 = vpop.eup %4345 }
 0x51d   :  { %v3250_v51 = vmul.f32 0.6931472, %v4346_v50 }
 0x51f   :  { %v3252_v53 = vsub.f32 %v3238_v45, %v3250_v51 }
 0x521   :  { %v3684_v54 = vpack.c.bf16 %v3252_v53, %v3251_v52 }
 0x523   :  { %3685 = vst [vmem:[%s5787_s7] sm:$0xff] %v3684_v54  }

</bundles_post_ra>
